<compile_context>
chip_gen: v7x
topology: tpu7x:2x2x1
jax: 0.10.0
libtpu: 0.0.40
codegen_flags: <defaults>
</compile_context>

<pallas_src>
import jax
import jax.numpy as jnp
from jax.experimental import pallas as pl
from jax.experimental.pallas import tpu as pltpu

SIZE = 128          # hidden size (lane-aligned)
NUM_LAYERS = 3      # -> num_inbetween_layers = 1
BATCH = 8
TB = 8              # batch tile (== BATCH here -> 1 batch tile, kept general)
T_STEPS = 8         # number of recurrent decode steps run inside the kernel
FORGET_BIAS = 1.0


# ----------------------------------------------------------------------------
# In-kernel MLP tail (layers 1..N of each net; layer 0 is fused across nets).
# ----------------------------------------------------------------------------
def _mlp_tail(a, rest, final_act):
    n = len(rest)
    for i, (W, b) in enumerate(rest):
        a = jnp.dot(a.astype(W.dtype), W, preferred_element_type=jnp.float32) + b
        a = jnp.maximum(a, 0.0) if i < n - 1 else final_act(a)
    return a


def _make_kernel(n_arn_rest, n_add_rest, n_wci_rest, s):
    def kernel(*refs):
        x_ref, h0_ref, c0_ref = refs[0], refs[1], refs[2]
        idx = 3
        W0cat = refs[idx][...]          # (2s, 3s) bf16, fused first layer
        b0cat = refs[idx + 1][...]      # (1, 3s)  f32
        idx += 2

        def take(n):
            nonlocal idx
            ps = tuple((refs[idx + 2 * i][...], refs[idx + 2 * i + 1][...])
                       for i in range(n))
            idx += 2 * n
            return ps

        arn_rest = take(n_arn_rest)     # adding_residual_normalizer (Sigmoid head)
        add_rest = take(n_add_rest)     # add_net (Tanh head)
        wci_rest = take(n_wci_rest)     # weight_cell_input_to_hidden (Sigmoid head)
        e_row = refs[idx][...]          # (1, s) f32 add_energy_net weight row
        idx += 1
        h_seq_ref, c_seq_ref = refs[idx], refs[idx + 1]
        h_scr, c_scr = refs[idx + 2], refs[idx + 3]

        t = pl.program_id(1)

        @pl.when(t == 0)
        def _():
            h_scr[...] = h0_ref[...]
            c_scr[...] = c0_ref[...]

        x = x_ref[0]                    # (TB, s)
        h = h_scr[...]
        c = c_scr[...]

        # Fused first layer: one K=256, N=384 MXU pass instead of six 128x128.
        info = jnp.concatenate([x, h], axis=-1).astype(W0cat.dtype)     # (TB, 2s)
        fused = jnp.dot(info, W0cat, preferred_element_type=jnp.float32) + b0cat
        fused = jnp.maximum(fused, 0.0)                                 # (TB, 3s)
        a_arn = fused[:, 0 * s:1 * s]
        a_add = fused[:, 1 * s:2 * s]
        a_wci = fused[:, 2 * s:3 * s]

        sig = jax.nn.sigmoid
        arn = _mlp_tail(a_arn, arn_rest, sig)
        add = _mlp_tail(a_add, add_rest, jnp.tanh)
        wci = _mlp_tail(a_wci, wci_rest, sig)

        new_info = arn * add
        # add_energy_net: VPU multiply + lane reduce instead of an N=1 MXU pass.
        energy = jnp.sum(c * e_row, axis=-1, keepdims=True)             # (TB, 1)
        updated_cell = c + new_info * energy
        updated_hidden = wci * jnp.tanh(updated_cell)

        h_seq_ref[0] = updated_hidden.astype(h_seq_ref.dtype)
        c_seq_ref[0] = updated_cell.astype(c_seq_ref.dtype)
        h_scr[...] = updated_hidden
        c_scr[...] = updated_cell

    return kernel


# ----------------------------------------------------------------------------
# Wrapper: one pallas_call runs the whole T-step recurrence.
# ----------------------------------------------------------------------------
def variable_cell_lstm_scan_pallas(xs, hidden0, cell0, kparams):
    T, B, s = xs.shape
    assert B % TB == 0

    flat = [kparams["W0cat"], kparams["b0cat"]]
    for net in ("arn_rest", "add_rest", "wcith_rest"):
        for W, b in kparams[net]:
            flat += [W, b]
    flat.append(kparams["energy_row"])

    x_spec = pl.BlockSpec((1, TB, s), lambda b, t: (t, b, 0))
    state_spec = pl.BlockSpec((TB, s), lambda b, t: (b, 0))
    # Grid-invariant weight blocks: fetched once, never re-DMA'd across steps.
    param_specs = [pl.BlockSpec(p.shape, lambda b, t: (0, 0)) for p in flat]
    out_spec = pl.BlockSpec((1, TB, s), lambda b, t: (t, b, 0))

    kernel = _make_kernel(len(kparams["arn_rest"]),
                          len(kparams["add_rest"]),
                          len(kparams["wcith_rest"]), s)

    grid_spec = pltpu.PrefetchScalarGridSpec(
        num_scalar_prefetch=0,
        grid=(B // TB, T),
        in_specs=[x_spec, state_spec, state_spec] + param_specs,
        out_specs=(out_spec, out_spec),
        scratch_shapes=[pltpu.VMEM((TB, s), jnp.float32),   # carried hidden
                        pltpu.VMEM((TB, s), jnp.float32)],  # carried cell
    )

    out_shape = (jax.ShapeDtypeStruct((T, B, s), jnp.float32),
                 jax.ShapeDtypeStruct((T, B, s), jnp.float32))

    fn = pl.pallas_call(
        kernel,
        out_shape=out_shape,
        grid_spec=grid_spec,
        compiler_params=pltpu.CompilerParams(
            dimension_semantics=("parallel", "arbitrary")),
    )
    return fn(xs, hidden0, cell0, *flat)


# ----------------------------------------------------------------------------
# Deterministic parameter construction (mirrors nn.Linear default init).
# Weights are held at bf16 precision (review item); biases stay f32.
# ----------------------------------------------------------------------------
def _init_linear(key, fan_in, fan_out, bias=True):
    bound = 1.0 / float(fan_in) ** 0.5
    kw, kb = jax.random.split(key)
    W = jax.random.uniform(kw, (fan_in, fan_out), jnp.float32, -bound, bound)
    W = W.astype(jnp.bfloat16).astype(jnp.float32)   # bf16-representable weights
    b = (jax.random.uniform(kb, (1, fan_out), jnp.float32, -bound, bound)
         if bias else None)
    return W, b


def build_params(size, num_layers, forget_bias, key):
    num_inbetween = max(0, num_layers - 2)

    def net_shapes(extra_mid=0):
        shapes = [(2 * size, size)]
        shapes += [(size, size)] * (num_inbetween + extra_mid)
        shapes += [(size, size)]
        return shapes

    params = {}
    for name, extra in (("forget", 0), ("arn", 0), ("add", 0), ("wcith", 1)):
        layers = []
        for fan_in, fan_out in net_shapes(extra):
            key, sub = jax.random.split(key)
            layers.append(_init_linear(sub, fan_in, fan_out))
        params[name] = layers

    # forget[-3].weight += forget_bias (last Linear of the dead forget net)
    W_last, b_last = params["forget"][-1]
    params["forget"][-1] = (W_last + forget_bias, b_last)

    key, sub = jax.random.split(key)
    params["energy_W"], _ = _init_linear(sub, size, 1, bias=False)
    return params


def pack_params(params):
    """Kernel-side layout: fused bf16 first layer + bf16 tails + energy row."""
    arn0_W, arn0_b = params["arn"][0]
    add0_W, add0_b = params["add"][0]
    wci0_W, wci0_b = params["wcith"][0]
    W0cat = jnp.concatenate([arn0_W, add0_W, wci0_W], axis=1).astype(jnp.bfloat16)
    b0cat = jnp.concatenate([arn0_b, add0_b, wci0_b], axis=1)

    def rest(name):
        return [(W.astype(jnp.bfloat16), b) for (W, b) in params[name][1:]]

    return dict(W0cat=W0cat, b0cat=b0cat,
                arn_rest=rest("arn"), add_rest=rest("add"),
                wcith_rest=rest("wcith"),
                energy_row=params["energy_W"].T)       # (1, s) f32


# ----------------------------------------------------------------------------
# Pure-JAX reference (literal transcription of the PyTorch forward, eval mode),
# scanned over time for the multi-step comparison.
# ----------------------------------------------------------------------------
def reference_forward(x, hidden, cell, params):
    info = jnp.concatenate([x, hidden], axis=-1)

    def run(net, inp, final):
        a = inp
        layers = params[net]
        for i, (W, b) in enumerate(layers):
            a = a @ W + b
            a = jax.nn.relu(a) if i < len(layers) - 1 else final(a)
        return a

    _cleared_cell = run("forget", info, jax.nn.sigmoid) * cell  # unused, as in reference
    new_info = run("arn", info, jax.nn.sigmoid) * run("add", info, jnp.tanh)
    new_info_weighted = new_info * (cell @ params["energy_W"])
    updated_cell = cell + new_info_weighted
    updated_hidden = run("wcith", info, jax.nn.sigmoid) * jnp.tanh(updated_cell)
    return updated_hidden, updated_cell


def reference_scan(xs, hidden0, cell0, params):
    def step(carry, x):
        h, c = carry
        h2, c2 = reference_forward(x, h, c, params)
        return (h2, c2), (h2, c2)

    _, (hs, cs) = jax.lax.scan(step, (hidden0, cell0), xs)
    return hs, cs


if __name__ == "__main__":
    key = jax.random.PRNGKey(0)
    kx, kh, kc, kp = jax.random.split(key, 4)

    xs = jax.random.normal(kx, (T_STEPS, BATCH, SIZE), jnp.float32)
    hidden0 = jax.random.normal(kh, (BATCH, SIZE), jnp.float32)
    cell0 = jax.random.normal(kc, (BATCH, SIZE), jnp.float32)

    params = build_params(SIZE, NUM_LAYERS, FORGET_BIAS, kp)
    kparams = pack_params(params)

    h_seq, c_seq = variable_cell_lstm_scan_pallas(xs, hidden0, cell0, kparams)
    jax.block_until_ready((h_seq, c_seq))

    h_ref, c_ref = reference_scan(xs, hidden0, cell0, params)
    assert h_seq.shape == (T_STEPS, BATCH, SIZE)
    assert c_seq.shape == (T_STEPS, BATCH, SIZE)
    # bf16 weights / bf16 MXU activations vs f32 reference -> loosened tolerance.
    assert jnp.allclose(h_seq, h_ref, atol=5e-2, rtol=5e-2), "hidden mismatch"
    assert jnp.allclose(c_seq, c_ref, atol=5e-2, rtol=5e-2), "cell mismatch"

    print("KERNEL_OK")
</pallas_src>

<mosaic_0001>
module attributes {stable_mosaic.version = 11 : i64} {
  func.func @kernel(%arg0: i32, %arg1: i32, %arg2: memref<1x8x128xf32, #tpu.memory_space<vmem>>, %arg3: memref<8x128xf32, #tpu.memory_space<vmem>>, %arg4: memref<8x128xf32, #tpu.memory_space<vmem>>, %arg5: memref<256x384xbf16, #tpu.memory_space<vmem>>, %arg6: memref<1x384xf32, #tpu.memory_space<vmem>>, %arg7: memref<128x128xbf16, #tpu.memory_space<vmem>>, %arg8: memref<1x128xf32, #tpu.memory_space<vmem>>, %arg9: memref<128x128xbf16, #tpu.memory_space<vmem>>, %arg10: memref<1x128xf32, #tpu.memory_space<vmem>>, %arg11: memref<128x128xbf16, #tpu.memory_space<vmem>>, %arg12: memref<1x128xf32, #tpu.memory_space<vmem>>, %arg13: memref<128x128xbf16, #tpu.memory_space<vmem>>, %arg14: memref<1x128xf32, #tpu.memory_space<vmem>>, %arg15: memref<128x128xbf16, #tpu.memory_space<vmem>>, %arg16: memref<1x128xf32, #tpu.memory_space<vmem>>, %arg17: memref<128x128xbf16, #tpu.memory_space<vmem>>, %arg18: memref<1x128xf32, #tpu.memory_space<vmem>>, %arg19: memref<128x128xbf16, #tpu.memory_space<vmem>>, %arg20: memref<1x128xf32, #tpu.memory_space<vmem>>, %arg21: memref<1x128xf32, #tpu.memory_space<vmem>>, %arg22: memref<1x8x128xf32, #tpu.memory_space<vmem>>, %arg23: memref<1x8x128xf32, #tpu.memory_space<vmem>>, %arg24: memref<8x128xf32, #tpu.memory_space<vmem>>, %arg25: memref<8x128xf32, #tpu.memory_space<vmem>>) attributes {dimension_semantics = [#tpu.dimension_semantics<parallel>, #tpu.dimension_semantics<arbitrary>], iteration_bounds = array<i64: 1, 8>, scalar_prefetch = 0 : i64, scratch_operands = 2 : i64, tpu.core_type = #tpu.core_type<tc>, window_params = [{transform_indices = @transform_0, window_bounds = array<i64: 1, 8, 128>}, {transform_indices = @transform_1, window_bounds = array<i64: 8, 128>}, {transform_indices = @transform_2, window_bounds = array<i64: 8, 128>}, {pipeline_mode = #tpu.pipeline_mode<synchronous>, transform_indices = @transform_3, window_bounds = array<i64: 256, 384>}, {pipeline_mode = #tpu.pipeline_mode<synchronous>, transform_indices = @transform_4, window_bounds = array<i64: 1, 384>}, {pipeline_mode = #tpu.pipeline_mode<synchronous>, transform_indices = @transform_5, window_bounds = array<i64: 128, 128>}, {pipeline_mode = #tpu.pipeline_mode<synchronous>, transform_indices = @transform_6, window_bounds = array<i64: 1, 128>}, {pipeline_mode = #tpu.pipeline_mode<synchronous>, transform_indices = @transform_7, window_bounds = array<i64: 128, 128>}, {pipeline_mode = #tpu.pipeline_mode<synchronous>, transform_indices = @transform_8, window_bounds = array<i64: 1, 128>}, {pipeline_mode = #tpu.pipeline_mode<synchronous>, transform_indices = @transform_9, window_bounds = array<i64: 128, 128>}, {pipeline_mode = #tpu.pipeline_mode<synchronous>, transform_indices = @transform_10, window_bounds = array<i64: 1, 128>}, {pipeline_mode = #tpu.pipeline_mode<synchronous>, transform_indices = @transform_11, window_bounds = array<i64: 128, 128>}, {pipeline_mode = #tpu.pipeline_mode<synchronous>, transform_indices = @transform_12, window_bounds = array<i64: 1, 128>}, {pipeline_mode = #tpu.pipeline_mode<synchronous>, transform_indices = @transform_13, window_bounds = array<i64: 128, 128>}, {pipeline_mode = #tpu.pipeline_mode<synchronous>, transform_indices = @transform_14, window_bounds = array<i64: 1, 128>}, {pipeline_mode = #tpu.pipeline_mode<synchronous>, transform_indices = @transform_15, window_bounds = array<i64: 128, 128>}, {pipeline_mode = #tpu.pipeline_mode<synchronous>, transform_indices = @transform_16, window_bounds = array<i64: 1, 128>}, {pipeline_mode = #tpu.pipeline_mode<synchronous>, transform_indices = @transform_17, window_bounds = array<i64: 128, 128>}, {pipeline_mode = #tpu.pipeline_mode<synchronous>, transform_indices = @transform_18, window_bounds = array<i64: 1, 128>}, {pipeline_mode = #tpu.pipeline_mode<synchronous>, transform_indices = @transform_19, window_bounds = array<i64: 1, 128>}, {transform_indices = @transform_20, window_bounds = array<i64: 1, 8, 128>}, {transform_indices = @transform_21, window_bounds = array<i64: 1, 8, 128>}]} {
    %c0 = arith.constant 0 : index
    %c0_0 = arith.constant 0 : index
    %0 = vector.load %arg5[%c0, %c0_0] : memref<256x384xbf16, #tpu.memory_space<vmem>>, vector<256x384xbf16>
    %c0_1 = arith.constant 0 : index
    %c0_2 = arith.constant 0 : index
    %1 = vector.load %arg6[%c0_1, %c0_2] : memref<1x384xf32, #tpu.memory_space<vmem>>, vector<1x384xf32>
    %c0_3 = arith.constant 0 : index
    %c0_4 = arith.constant 0 : index
    %2 = vector.load %arg7[%c0_3, %c0_4] : memref<128x128xbf16, #tpu.memory_space<vmem>>, vector<128x128xbf16>
    %c0_5 = arith.constant 0 : index
    %c0_6 = arith.constant 0 : index
    %3 = vector.load %arg8[%c0_5, %c0_6] : memref<1x128xf32, #tpu.memory_space<vmem>>, vector<1x128xf32>
    %c0_7 = arith.constant 0 : index
    %c0_8 = arith.constant 0 : index
    %4 = vector.load %arg9[%c0_7, %c0_8] : memref<128x128xbf16, #tpu.memory_space<vmem>>, vector<128x128xbf16>
    %c0_9 = arith.constant 0 : index
    %c0_10 = arith.constant 0 : index
    %5 = vector.load %arg10[%c0_9, %c0_10] : memref<1x128xf32, #tpu.memory_space<vmem>>, vector<1x128xf32>
    %c0_11 = arith.constant 0 : index
    %c0_12 = arith.constant 0 : index
    %6 = vector.load %arg11[%c0_11, %c0_12] : memref<128x128xbf16, #tpu.memory_space<vmem>>, vector<128x128xbf16>
    %c0_13 = arith.constant 0 : index
    %c0_14 = arith.constant 0 : index
    %7 = vector.load %arg12[%c0_13, %c0_14] : memref<1x128xf32, #tpu.memory_space<vmem>>, vector<1x128xf32>
    %c0_15 = arith.constant 0 : index
    %c0_16 = arith.constant 0 : index
    %8 = vector.load %arg13[%c0_15, %c0_16] : memref<128x128xbf16, #tpu.memory_space<vmem>>, vector<128x128xbf16>
    %c0_17 = arith.constant 0 : index
    %c0_18 = arith.constant 0 : index
    %9 = vector.load %arg14[%c0_17, %c0_18] : memref<1x128xf32, #tpu.memory_space<vmem>>, vector<1x128xf32>
    %c0_19 = arith.constant 0 : index
    %c0_20 = arith.constant 0 : index
    %10 = vector.load %arg15[%c0_19, %c0_20] : memref<128x128xbf16, #tpu.memory_space<vmem>>, vector<128x128xbf16>
    %c0_21 = arith.constant 0 : index
    %c0_22 = arith.constant 0 : index
    %11 = vector.load %arg16[%c0_21, %c0_22] : memref<1x128xf32, #tpu.memory_space<vmem>>, vector<1x128xf32>
    %c0_23 = arith.constant 0 : index
    %c0_24 = arith.constant 0 : index
    %12 = vector.load %arg17[%c0_23, %c0_24] : memref<128x128xbf16, #tpu.memory_space<vmem>>, vector<128x128xbf16>
    %c0_25 = arith.constant 0 : index
    %c0_26 = arith.constant 0 : index
    %13 = vector.load %arg18[%c0_25, %c0_26] : memref<1x128xf32, #tpu.memory_space<vmem>>, vector<1x128xf32>
    %c0_27 = arith.constant 0 : index
    %c0_28 = arith.constant 0 : index
    %14 = vector.load %arg19[%c0_27, %c0_28] : memref<128x128xbf16, #tpu.memory_space<vmem>>, vector<128x128xbf16>
    %c0_29 = arith.constant 0 : index
    %c0_30 = arith.constant 0 : index
    %15 = vector.load %arg20[%c0_29, %c0_30] : memref<1x128xf32, #tpu.memory_space<vmem>>, vector<1x128xf32>
    %c0_31 = arith.constant 0 : index
    %c0_32 = arith.constant 0 : index
    %16 = vector.load %arg21[%c0_31, %c0_32] : memref<1x128xf32, #tpu.memory_space<vmem>>, vector<1x128xf32>
    %c0_i32 = arith.constant 0 : i32
    %17 = arith.cmpi eq, %arg1, %c0_i32 : i32
    %18 = arith.extui %17 : i1 to i32
    %c0_i32_33 = arith.constant 0 : i32
    %19 = arith.cmpi ne, %18, %c0_i32_33 : i32
    scf.if %19 {
      %c0_66 = arith.constant 0 : index
      %c0_67 = arith.constant 0 : index
      %99 = vector.load %arg3[%c0_66, %c0_67] : memref<8x128xf32, #tpu.memory_space<vmem>>, vector<8x128xf32>
      %c0_68 = arith.constant 0 : index
      %c0_69 = arith.constant 0 : index
      %100 = vector.load %arg24[%c0_68, %c0_69] : memref<8x128xf32, #tpu.memory_space<vmem>>, vector<8x128xf32>
      tpu.vector_store %arg24[%c0_68, %c0_69], %99 {strides = array<i32>} : memref<8x128xf32, #tpu.memory_space<vmem>>, vector<8x128xf32>,
      %c0_70 = arith.constant 0 : index
      %c0_71 = arith.constant 0 : index
      %101 = vector.load %arg4[%c0_70, %c0_71] : memref<8x128xf32, #tpu.memory_space<vmem>>, vector<8x128xf32>
      %c0_72 = arith.constant 0 : index
      %c0_73 = arith.constant 0 : index
      %102 = vector.load %arg25[%c0_72, %c0_73] : memref<8x128xf32, #tpu.memory_space<vmem>>, vector<8x128xf32>
      tpu.vector_store %arg25[%c0_72, %c0_73], %101 {strides = array<i32>} : memref<8x128xf32, #tpu.memory_space<vmem>>, vector<8x128xf32>,
    } else {
    }
    %c0_34 = arith.constant 0 : index
    %c0_35 = arith.constant 0 : index
    %c0_36 = arith.constant 0 : index
    %20 = vector.load %arg2[%c0_34, %c0_35, %c0_36] : memref<1x8x128xf32, #tpu.memory_space<vmem>>, vector<1x8x128xf32>
    %21 = vector.shape_cast %20 : vector<1x8x128xf32> to vector<8x128xf32>
    %c0_37 = arith.constant 0 : index
    %c0_38 = arith.constant 0 : index
    %22 = vector.load %arg24[%c0_37, %c0_38] : memref<8x128xf32, #tpu.memory_space<vmem>>, vector<8x128xf32>
    %c0_39 = arith.constant 0 : index
    %c0_40 = arith.constant 0 : index
    %23 = vector.load %arg25[%c0_39, %c0_40] : memref<8x128xf32, #tpu.memory_space<vmem>>, vector<8x128xf32>
    %24 = tpu.concatenate %21, %22 in 1 : vector<8x128xf32>, vector<8x128xf32> -> vector<8x256xf32>
    %25 = arith.truncf %24 : vector<8x256xf32> to vector<8x256xbf16>
    %cst = arith.constant dense<0.000000e+00> : vector<8x384xf32>
    %26 = tpu.matmul %25, %0, %cst {dimension_numbers = #tpu.dot_dimension_numbers<[1], [0], [0], [1], [0, 0, 1, 1], [], []>} : vector<8x256xbf16>, vector<256x384xbf16>, vector<8x384xf32> -> vector<8x384xf32>
    %27 = vector.broadcast %1 : vector<1x384xf32> to vector<8x384xf32>
    %28 = arith.addf %26, %27 : vector<8x384xf32>
    %cst_41 = arith.constant 0.000000e+00 : f32
    %29 = vector.broadcast %cst_41 : f32 to vector<8x384xf32>
    %30 = arith.maximumf %28, %29 : vector<8x384xf32>
    %31 = vector.extract_strided_slice %30 {offsets = [0, 0], sizes = [8, 128], strides = [1, 1]} : vector<8x384xf32> to vector<8x128xf32>
    %32 = vector.extract_strided_slice %30 {offsets = [0, 128], sizes = [8, 128], strides = [1, 1]} : vector<8x384xf32> to vector<8x128xf32>
    %33 = vector.extract_strided_slice %30 {offsets = [0, 256], sizes = [8, 128], strides = [1, 1]} : vector<8x384xf32> to vector<8x128xf32>
    %34 = arith.truncf %31 : vector<8x128xf32> to vector<8x128xbf16>
    %cst_42 = arith.constant dense<0.000000e+00> : vector<8x128xf32>
    %35 = tpu.matmul %34, %2, %cst_42 {dimension_numbers = #tpu.dot_dimension_numbers<[1], [0], [0], [1], [0, 0, 1, 1], [], []>} : vector<8x128xbf16>, vector<128x128xbf16>, vector<8x128xf32> -> vector<8x128xf32>
    %36 = vector.broadcast %3 : vector<1x128xf32> to vector<8x128xf32>
    %37 = arith.addf %35, %36 : vector<8x128xf32>
    %cst_43 = arith.constant 0.000000e+00 : f32
    %38 = vector.broadcast %cst_43 : f32 to vector<8x128xf32>
    %39 = arith.maximumf %37, %38 : vector<8x128xf32>
    %40 = arith.truncf %39 : vector<8x128xf32> to vector<8x128xbf16>
    %cst_44 = arith.constant dense<0.000000e+00> : vector<8x128xf32>
    %41 = tpu.matmul %40, %4, %cst_44 {dimension_numbers = #tpu.dot_dimension_numbers<[1], [0], [0], [1], [0, 0, 1, 1], [], []>} : vector<8x128xbf16>, vector<128x128xbf16>, vector<8x128xf32> -> vector<8x128xf32>
    %42 = vector.broadcast %5 : vector<1x128xf32> to vector<8x128xf32>
    %43 = arith.addf %41, %42 : vector<8x128xf32>
    %44 = arith.negf %43 : vector<8x128xf32>
    %45 = math.exp %44 : vector<8x128xf32>
    %cst_45 = arith.constant 1.000000e+00 : f32
    %46 = vector.broadcast %cst_45 : f32 to vector<8x128xf32>
    %47 = arith.addf %46, %45 : vector<8x128xf32>
    %48 = arith.divf %46, %47 : vector<8x128xf32>
    %49 = arith.truncf %32 : vector<8x128xf32> to vector<8x128xbf16>
    %cst_46 = arith.constant dense<0.000000e+00> : vector<8x128xf32>
    %50 = tpu.matmul %49, %6, %cst_46 {dimension_numbers = #tpu.dot_dimension_numbers<[1], [0], [0], [1], [0, 0, 1, 1], [], []>} : vector<8x128xbf16>, vector<128x128xbf16>, vector<8x128xf32> -> vector<8x128xf32>
    %51 = vector.broadcast %7 : vector<1x128xf32> to vector<8x128xf32>
    %52 = arith.addf %50, %51 : vector<8x128xf32>
    %cst_47 = arith.constant 0.000000e+00 : f32
    %53 = vector.broadcast %cst_47 : f32 to vector<8x128xf32>
    %54 = arith.maximumf %52, %53 : vector<8x128xf32>
    %55 = arith.truncf %54 : vector<8x128xf32> to vector<8x128xbf16>
    %cst_48 = arith.constant dense<0.000000e+00> : vector<8x128xf32>
    %56 = tpu.matmul %55, %8, %cst_48 {dimension_numbers = #tpu.dot_dimension_numbers<[1], [0], [0], [1], [0, 0, 1, 1], [], []>} : vector<8x128xbf16>, vector<128x128xbf16>, vector<8x128xf32> -> vector<8x128xf32>
    %57 = vector.broadcast %9 : vector<1x128xf32> to vector<8x128xf32>
    %58 = arith.addf %56, %57 : vector<8x128xf32>
    %59 = math.tanh %58 : vector<8x128xf32>
    %60 = arith.truncf %33 : vector<8x128xf32> to vector<8x128xbf16>
    %cst_49 = arith.constant dense<0.000000e+00> : vector<8x128xf32>
    %61 = tpu.matmul %60, %10, %cst_49 {dimension_numbers = #tpu.dot_dimension_numbers<[1], [0], [0], [1], [0, 0, 1, 1], [], []>} : vector<8x128xbf16>, vector<128x128xbf16>, vector<8x128xf32> -> vector<8x128xf32>
    %62 = vector.broadcast %11 : vector<1x128xf32> to vector<8x128xf32>
    %63 = arith.addf %61, %62 : vector<8x128xf32>
    %cst_50 = arith.constant 0.000000e+00 : f32
    %64 = vector.broadcast %cst_50 : f32 to vector<8x128xf32>
    %65 = arith.maximumf %63, %64 : vector<8x128xf32>
    %66 = arith.truncf %65 : vector<8x128xf32> to vector<8x128xbf16>
    %cst_51 = arith.constant dense<0.000000e+00> : vector<8x128xf32>
    %67 = tpu.matmul %66, %12, %cst_51 {dimension_numbers = #tpu.dot_dimension_numbers<[1], [0], [0], [1], [0, 0, 1, 1], [], []>} : vector<8x128xbf16>, vector<128x128xbf16>, vector<8x128xf32> -> vector<8x128xf32>
    %68 = vector.broadcast %13 : vector<1x128xf32> to vector<8x128xf32>
    %69 = arith.addf %67, %68 : vector<8x128xf32>
    %cst_52 = arith.constant 0.000000e+00 : f32
    %70 = vector.broadcast %cst_52 : f32 to vector<8x128xf32>
    %71 = arith.maximumf %69, %70 : vector<8x128xf32>
    %72 = arith.truncf %71 : vector<8x128xf32> to vector<8x128xbf16>
    %cst_53 = arith.constant dense<0.000000e+00> : vector<8x128xf32>
    %73 = tpu.matmul %72, %14, %cst_53 {dimension_numbers = #tpu.dot_dimension_numbers<[1], [0], [0], [1], [0, 0, 1, 1], [], []>} : vector<8x128xbf16>, vector<128x128xbf16>, vector<8x128xf32> -> vector<8x128xf32>
    %74 = vector.broadcast %15 : vector<1x128xf32> to vector<8x128xf32>
    %75 = arith.addf %73, %74 : vector<8x128xf32>
    %76 = arith.negf %75 : vector<8x128xf32>
    %77 = math.exp %76 : vector<8x128xf32>
    %cst_54 = arith.constant 1.000000e+00 : f32
    %78 = vector.broadcast %cst_54 : f32 to vector<8x128xf32>
    %79 = arith.addf %78, %77 : vector<8x128xf32>
    %80 = arith.divf %78, %79 : vector<8x128xf32>
    %81 = arith.mulf %48, %59 : vector<8x128xf32>
    %82 = vector.broadcast %16 : vector<1x128xf32> to vector<8x128xf32>
    %83 = arith.mulf %23, %82 : vector<8x128xf32>
    %cst_55 = arith.constant dense<0.000000e+00> : vector<8xf32>
    %84 = vector.multi_reduction <add>, %83, %cst_55 [1] : vector<8x128xf32> to vector<8xf32>
    %85 = vector.shape_cast %84 : vector<8xf32> to vector<8x1xf32>
    %86 = vector.broadcast %85 : vector<8x1xf32> to vector<8x128xf32>
    %87 = arith.mulf %81, %86 : vector<8x128xf32>
    %88 = arith.addf %23, %87 : vector<8x128xf32>
    %89 = math.tanh %88 : vector<8x128xf32>
    %90 = arith.mulf %80, %89 : vector<8x128xf32>
    %c0_56 = arith.constant 0 : index
    %c0_57 = arith.constant 0 : index
    %c0_58 = arith.constant 0 : index
    %91 = vector.load %arg22[%c0_56, %c0_57, %c0_58] : memref<1x8x128xf32, #tpu.memory_space<vmem>>, vector<1x8x128xf32>
    %92 = vector.shape_cast %91 : vector<1x8x128xf32> to vector<8x128xf32>
    %93 = vector.shape_cast %90 : vector<8x128xf32> to vector<1x8x128xf32>
    tpu.vector_store %arg22[%c0_56, %c0_57, %c0_58], %93 {strides = array<i32>} : memref<1x8x128xf32, #tpu.memory_space<vmem>>, vector<1x8x128xf32>,
    %c0_59 = arith.constant 0 : index
    %c0_60 = arith.constant 0 : index
    %c0_61 = arith.constant 0 : index
    %94 = vector.load %arg23[%c0_59, %c0_60, %c0_61] : memref<1x8x128xf32, #tpu.memory_space<vmem>>, vector<1x8x128xf32>
    %95 = vector.shape_cast %94 : vector<1x8x128xf32> to vector<8x128xf32>
    %96 = vector.shape_cast %88 : vector<8x128xf32> to vector<1x8x128xf32>
    tpu.vector_store %arg23[%c0_59, %c0_60, %c0_61], %96 {strides = array<i32>} : memref<1x8x128xf32, #tpu.memory_space<vmem>>, vector<1x8x128xf32>,
    %c0_62 = arith.constant 0 : index
    %c0_63 = arith.constant 0 : index
    %97 = vector.load %arg24[%c0_62, %c0_63] : memref<8x128xf32, #tpu.memory_space<vmem>>, vector<8x128xf32>
    tpu.vector_store %arg24[%c0_62, %c0_63], %90 {strides = array<i32>} : memref<8x128xf32, #tpu.memory_space<vmem>>, vector<8x128xf32>,
    %c0_64 = arith.constant 0 : index
    %c0_65 = arith.constant 0 : index
    %98 = vector.load %arg25[%c0_64, %c0_65] : memref<8x128xf32, #tpu.memory_space<vmem>>, vector<8x128xf32>
    tpu.vector_store %arg25[%c0_64, %c0_65], %88 {strides = array<i32>} : memref<8x128xf32, #tpu.memory_space<vmem>>, vector<8x128xf32>,
    return
  }
  func.func @transform_0(%arg0: i32, %arg1: i32) -> (i32, i32, i32) {
    %c0_i32 = arith.constant 0 : i32
    %c0_i32_0 = arith.constant 0 : i32
    return %arg1, %arg0, %c0_i32 : i32, i32, i32
  }
  func.func @transform_1(%arg0: i32, %arg1: i32) -> (i32, i32) {
    %c0_i32 = arith.constant 0 : i32
    %c0_i32_0 = arith.constant 0 : i32
    return %arg0, %c0_i32 : i32, i32
  }
  func.func @transform_2(%arg0: i32, %arg1: i32) -> (i32, i32) {
    %c0_i32 = arith.constant 0 : i32
    %c0_i32_0 = arith.constant 0 : i32
    return %arg0, %c0_i32 : i32, i32
  }
  func.func @transform_3(%arg0: i32, %arg1: i32) -> (i32, i32) {
    %c0_i32 = arith.constant 0 : i32
    %c0_i32_0 = arith.constant 0 : i32
    %c0_i32_1 = arith.constant 0 : i32
    return %c0_i32, %c0_i32_0 : i32, i32
  }
  func.func @transform_4(%arg0: i32, %arg1: i32) -> (i32, i32) {
    %c0_i32 = arith.constant 0 : i32
    %c0_i32_0 = arith.constant 0 : i32
    %c0_i32_1 = arith.constant 0 : i32
    return %c0_i32, %c0_i32_0 : i32, i32
  }
  func.func @transform_5(%arg0: i32, %arg1: i32) -> (i32, i32) {
    %c0_i32 = arith.constant 0 : i32
    %c0_i32_0 = arith.constant 0 : i32
    %c0_i32_1 = arith.constant 0 : i32
    return %c0_i32, %c0_i32_0 : i32, i32
  }
  func.func @transform_6(%arg0: i32, %arg1: i32) -> (i32, i32) {
    %c0_i32 = arith.constant 0 : i32
    %c0_i32_0 = arith.constant 0 : i32
    %c0_i32_1 = arith.constant 0 : i32
    return %c0_i32, %c0_i32_0 : i32, i32
  }
  func.func @transform_7(%arg0: i32, %arg1: i32) -> (i32, i32) {
    %c0_i32 = arith.constant 0 : i32
    %c0_i32_0 = arith.constant 0 : i32
    %c0_i32_1 = arith.constant 0 : i32
    return %c0_i32, %c0_i32_0 : i32, i32
  }
  func.func @transform_8(%arg0: i32, %arg1: i32) -> (i32, i32) {
    %c0_i32 = arith.constant 0 : i32
    %c0_i32_0 = arith.constant 0 : i32
    %c0_i32_1 = arith.constant 0 : i32
    return %c0_i32, %c0_i32_0 : i32, i32
  }
  func.func @transform_9(%arg0: i32, %arg1: i32) -> (i32, i32) {
    %c0_i32 = arith.constant 0 : i32
    %c0_i32_0 = arith.constant 0 : i32
    %c0_i32_1 = arith.constant 0 : i32
    return %c0_i32, %c0_i32_0 : i32, i32
  }
  func.func @transform_10(%arg0: i32, %arg1: i32) -> (i32, i32) {
    %c0_i32 = arith.constant 0 : i32
    %c0_i32_0 = arith.constant 0 : i32
    %c0_i32_1 = arith.constant 0 : i32
    return %c0_i32, %c0_i32_0 : i32, i32
  }
  func.func @transform_11(%arg0: i32, %arg1: i32) -> (i32, i32) {
    %c0_i32 = arith.constant 0 : i32
    %c0_i32_0 = arith.constant 0 : i32
    %c0_i32_1 = arith.constant 0 : i32
    return %c0_i32, %c0_i32_0 : i32, i32
  }
  func.func @transform_12(%arg0: i32, %arg1: i32) -> (i32, i32) {
    %c0_i32 = arith.constant 0 : i32
    %c0_i32_0 = arith.constant 0 : i32
    %c0_i32_1 = arith.constant 0 : i32
    return %c0_i32, %c0_i32_0 : i32, i32
  }
  func.func @transform_13(%arg0: i32, %arg1: i32) -> (i32, i32) {
    %c0_i32 = arith.constant 0 : i32
    %c0_i32_0 = arith.constant 0 : i32
    %c0_i32_1 = arith.constant 0 : i32
    return %c0_i32, %c0_i32_0 : i32, i32
  }
  func.func @transform_14(%arg0: i32, %arg1: i32) -> (i32, i32) {
    %c0_i32 = arith.constant 0 : i32
    %c0_i32_0 = arith.constant 0 : i32
    %c0_i32_1 = arith.constant 0 : i32
    return %c0_i32, %c0_i32_0 : i32, i32
  }
  func.func @transform_15(%arg0: i32, %arg1: i32) -> (i32, i32) {
    %c0_i32 = arith.constant 0 : i32
    %c0_i32_0 = arith.constant 0 : i32
    %c0_i32_1 = arith.constant 0 : i32
    return %c0_i32, %c0_i32_0 : i32, i32
  }
  func.func @transform_16(%arg0: i32, %arg1: i32) -> (i32, i32) {
    %c0_i32 = arith.constant 0 : i32
    %c0_i32_0 = arith.constant 0 : i32
    %c0_i32_1 = arith.constant 0 : i32
    return %c0_i32, %c0_i32_0 : i32, i32
  }
  func.func @transform_17(%arg0: i32, %arg1: i32) -> (i32, i32) {
    %c0_i32 = arith.constant 0 : i32
    %c0_i32_0 = arith.constant 0 : i32
    %c0_i32_1 = arith.constant 0 : i32
    return %c0_i32, %c0_i32_0 : i32, i32
  }
  func.func @transform_18(%arg0: i32, %arg1: i32) -> (i32, i32) {
    %c0_i32 = arith.constant 0 : i32
    %c0_i32_0 = arith.constant 0 : i32
    %c0_i32_1 = arith.constant 0 : i32
    return %c0_i32, %c0_i32_0 : i32, i32
  }
  func.func @transform_19(%arg0: i32, %arg1: i32) -> (i32, i32) {
    %c0_i32 = arith.constant 0 : i32
    %c0_i32_0 = arith.constant 0 : i32
    %c0_i32_1 = arith.constant 0 : i32
    return %c0_i32, %c0_i32_0 : i32, i32
  }
  func.func @transform_20(%arg0: i32, %arg1: i32) -> (i32, i32, i32) {
    %c0_i32 = arith.constant 0 : i32
    %c0_i32_0 = arith.constant 0 : i32
    return %arg1, %arg0, %c0_i32 : i32, i32, i32
  }
  func.func @transform_21(%arg0: i32, %arg1: i32) -> (i32, i32, i32) {
    %c0_i32 = arith.constant 0 : i32
    %c0_i32_0 = arith.constant 0 : i32
    return %arg1, %arg0, %c0_i32 : i32, i32, i32
  }
}

</mosaic_0001>

<bundles_post_ra>
// kernel: tpu_custom_call.1
= control target key start
LH: loop header
LB: loop body
LE: loop exit
PB: predicated region body
PF: predicated region fallthrough
CT: control target
= control target key end

     0   :  { %s5190_s0 = inlined_call_operand.hbm [shape: f32[8,8,128], index: 0, kind: input, shape index: {}]   ;;  %s5191_s1 = inlined_call_operand.hbm [shape: f32[8,128], index: 1, kind: input, shape index: {}]   ;;  %s5192_s2 = inlined_call_operand.hbm [shape: f32[8,128], index: 2, kind: input, shape index: {}]   ;;  %s5193_s3 = inlined_call_operand.hbm [shape: bf16[256,384], index: 3, kind: input, shape index: {}]   ;;  %s5194_s4 = inlined_call_operand.hbm [shape: f32[1,384], index: 4, kind: input, shape index: {}]   ;;  %s5195_s5 = inlined_call_operand.hbm [shape: bf16[128,128], index: 5, kind: input, shape index: {}]   ;;  %s5196_s6 = inlined_call_operand.hbm [shape: f32[1,128], index: 6, kind: input, shape index: {}]   ;;  %s5197_s7 = inlined_call_operand.hbm [shape: bf16[128,128], index: 7, kind: input, shape index: {}]   ;;  %s5198_s8 = inlined_call_operand.hbm [shape: f32[1,128], index: 8, kind: input, shape index: {}]   ;;  %s5199_s9 = inlined_call_operand.hbm [shape: bf16[128,128], index: 9, kind: input, shape index: {}]   ;;  %s5200_s10 = inlined_call_operand.hbm [shape: f32[1,128], index: 10, kind: input, shape index: {}]   ;;  %s5201_s11 = inlined_call_operand.hbm [shape: bf16[128,128], index: 11, kind: input, shape index: {}]   ;;  %s5202_s12 = inlined_call_operand.hbm [shape: f32[1,128], index: 12, kind: input, shape index: {}]   ;;  %s5203_s13 = inlined_call_operand.hbm [shape: bf16[128,128], index: 13, kind: input, shape index: {}]   ;;  %s5204_s14 = inlined_call_operand.hbm [shape: f32[1,128], index: 14, kind: input, shape index: {}]   ;;  %s5205_s15 = inlined_call_operand.hbm [shape: bf16[128,128], index: 15, kind: input, shape index: {}]   ;;  %s5206_s16 = inlined_call_operand.hbm [shape: f32[1,128], index: 16, kind: input, shape index: {}]   ;;  %s5207_s17 = inlined_call_operand.vmem [shape: bf16[128,128], index: 17, kind: input, shape index: {}]   ;;  %s5208_s18 = inlined_call_operand.vmem [shape: f32[1,128], index: 18, kind: input, shape index: {}]   ;;  %s5209_s19 = inlined_call_operand.vmem [shape: f32[1,128], index: 19, kind: input, shape index: {}]   ;;  %s5210_s20 = inlined_call_operand.hbm [shape: f32[8,8,128], index: 20, kind: output, shape index: {0}]   ;;  %s5211_s21 = inlined_call_operand.hbm [shape: f32[8,8,128], index: 21, kind: output, shape index: {1}]  }
   0x1   :  { %5249 = sst [smem:[#allocation180_spill]] %s5190_s0 }
   0x2   :  { %5250 = sst [smem:[#allocation181_spill]] %s5191_s1 }
   0x3   :  { %5251 = sst [smem:[#allocation182_spill]] %s5192_s2 }
   0x4   :  { %5252 = sst [smem:[#allocation183_spill]] %s5193_s3 }
   0x5   :  { %5253 = sst [smem:[#allocation184_spill]] %s5194_s4 }
   0x6   :  { %5254 = sst [smem:[#allocation185_spill]] %s5195_s5 }
   0x7   :  { %5255 = sst [smem:[#allocation186_spill]] %s5196_s6 }
   0x8   :  { %5256 = sst [smem:[#allocation187_spill]] %s5197_s7 }
   0x9   :  { %5257 = sst [smem:[#allocation188_spill]] %s5198_s8 }
   0xa   :  { %5258 = sst [smem:[#allocation189_spill]] %s5199_s9 }
   0xb   :  { %5259 = sst [smem:[#allocation190_spill]] %s5207_s17 }
   0xc   :  { %5260 = sst [smem:[#allocation191_spill]] %s5208_s18 }
   0xd   :  { %5261 = sst [smem:[#allocation192_spill]] %s5209_s19 }
   0xe   :  { %5262 = sst [smem:[#allocation193_spill]] %s5210_s20 }
   0xf   :  { %5263 = sst [smem:[#allocation194_spill]] %s5211_s21 }
  0x10   :  { %27 = vsyncpa [#allocation5], 0 }
  0x11   :  { %29 = vsyncpa [#allocation5 + $0x1], 0 }
  0x12   :  { %30 = vsyncpa [#allocation8], 0 }
  0x13   :  { %31 = vsyncpa [#allocation11], 0 }
  0x14   :  { %32 = vsyncpa [#allocation14], 0 }
  0x15   :  { %33 = vsyncpa [#allocation17], 0 }
  0x16   :  { %34 = vsyncpa [#allocation20], 0 }
  0x17   :  { %35 = vsyncpa [#allocation23], 0 }
  0x18   :  { %36 = vsyncpa [#allocation26], 0 }
  0x19   :  { %37 = vsyncpa [#allocation29], 0 }
  0x1a   :  { %38 = vsyncpa [#allocation6], 0 }
  0x1b   :  { %40 = vsyncpa [#allocation6 + $0x1], 0 }
  0x1c   :  { %41 = vsyncpa [#allocation33], 0 }
  0x1d   :  { %43 = vsyncpa [#allocation33 + $0x1], 0  ;;  %s3883_s2 = smov 0   ;;  %s3885_s25 = smov 0  }
  0x1e   :  { %s3887_s26 = smov 0   ;;  %s3889_s27 = smov 0  }
  0x1f   :  { %s3891_s3 = smov 0   ;;  %s3893_s28 = smov 0  }
  0x20 LB: > { %5264 = sst [smem:[#allocation45_spill]] %s3726_s2  ;;  %s5218_s29 = sadd.s32 4294967295, %s3746_s28   ;;  %s3746_s28 = sphi %s3893_s28, %s49_s28   ;;  %s3742_s3 = sphi %s3891_s3, %s5579_s3   ;;  %s3738_s27 = sphi %s3889_s27, %s5577_s27   ;;  %s3734_s26 = sphi %s3887_s26, %s5578_s26   ;;  %s3730_s25 = sphi %s3885_s25, %s5576_s25   ;;  %s3726_s2 = sphi %s3883_s2, %s5575_s2  }
  0x21   : > { %5265 = sst [smem:[#allocation46_spill]] %s3730_s25  ;;  %p2490_p0 = scmp.ge.s32.totalorder %s3746_s28, 1 }
  0x22   : > { %5266 = sst [smem:[#allocation47_spill]] %s3734_s26  ;;  %p3917_p1 = scmp.eq.s32.totalorder %s5218_s29, 0 }
  0x23   : > { %5267 = sst [smem:[#allocation48_spill]] %s3738_s27  ;;  %p559_p2 = scmp.lt.s32.totalorder %s3746_s28, 9 }
  0x24   : > { %5268 = sst [smem:[#allocation49_spill]] %s3742_s3  ;;  %s3748_s30 = smov [#allocation7]  }
  0x25   : > { %s5269_s0 = scalar_select %p3917_p1, 1, 0 }
  0x26   : > { %p3922_p3 = pnand %p2490_p0, %p559_p2  ;;  %s574_s5 = sshll.u32 %s3748_s30, 4  ;;  %s575_s5 = int_to_ptr.vmem [resolvable:$true] %s574_s5 }
  0x27   : > { %5270 = sst [smem:[#allocation50_spill]] %s5269_s0  ;;  %s3749_s22 = smov [#allocation10]  }
  0x28   : > { %s5271_s4 = scalar_select %p3922_p3, 1, 0 }
  0x29   : > { %p2946_p4 = pneg %p3922_p3  ;;  %s597_s23 = sshll.u32 %s3749_s22, 4  ;;  %s3934_s23 = int_to_ptr.vmem [resolvable:$true] %s597_s23 }
  0x2a   : > { %5272 = sst [smem:[#allocation51_spill]] %s5271_s4  ;;  %s3750_s24 = smov [#allocation13]  }
  0x2b   : > { %p3930_p5 = pnand %p2946_p4, %p3917_p1  ;;  %s3936_s29 = sshll.u32 %s3750_s24, 4  ;;  %s622_s29 = int_to_ptr.vmem [resolvable:$true] %s3936_s29 }
  0x2c   : > { %s5274_s27 = sld [smem:[#allocation181_spill]] }
  0x2d   : > { %p3946_p7 = pneg %p3930_p5 }
  0x32   : > { %s5275_s19 = smov %s5274_s27  ;;  %s3122_s30 = scalar_lea.hbm %s5274_s27, 128 }
  0x33   : > { %p3123_p6 = scmp.ne.s32.totalorder %s5275_s19, %s3122_s30  ;;  %p3129_p10 = scmp.lt.u32.totalorder %s3122_s30, %s5275_s19 }
  0x35   : > { %p3125_p8 = pnand %p3946_p7, %p3123_p6 }
  0x37   : > { %p3126_p9 = pneg %p3125_p8 }
  0x39   : > { %p3131_p11 = pnand %p3129_p10, %p3126_p9 }
  0x3b   : > { %3134 = shalt.err (!%p3131_p11)
}
  0x3c   : > { %s3135_s20 = scalar_lea.vmem %s575_s5, 128  ;;  %p3143_p2 = scmp.lt.s32.totalorder %s575_s5, %s575_s5 }
  0x3d   : > { %p3136_p12 = scmp.ne.s32.totalorder %s575_s5, %s3135_s20  ;;  %p3144_p4 = scmp.lt.s32.totalorder %s3135_s20, %s3135_s20 }
  0x3f   : > { %p3138_p13 = pnand %p3136_p12, %p3946_p7  ;;  %p3145_p3 = por %p3144_p4, %p3143_p2 }
  0x41   : > { %p3139_p0 = pneg %p3138_p13 }
  0x43   : > { %p3146_p1 = pnand %p3145_p3, %p3139_p0 }
  0x45   : > { %3149 = shalt.err (!%p3146_p1)
}
  0x46   : > { %2949 = dma.hbm_to_vmem [thread:$0]  (!%p3930_p5), %s5275_s19, 128, %s575_s5, [#allocation8]  }
  0x47   : > { %s5277_s4 = sld [smem:[#allocation183_spill]] }
  0x4d   : > { %s3150_s30 = scalar_lea.hbm %s5277_s4, 6144 }
  0x4e   : > { %p3151_p6 = scmp.ne.s32.totalorder %s5277_s4, %s3150_s30  ;;  %p3157_p1 = scmp.lt.u32.totalorder %s3150_s30, %s5277_s4 }
  0x50   : > { %p3153_p8 = pnand %p3151_p6, %p3946_p7 }
  0x52   : > { %p3154_p9 = pneg %p3153_p8 }
  0x54   : > { %p3159_p3 = pnand %p3157_p1, %p3154_p9 }
  0x56   : > { %3162 = shalt.err (!%p3159_p3)
}
  0x57   : > { %s3163_s5 = scalar_lea.vmem %s3934_s23, 6144  ;;  %p3171_p13 = scmp.lt.s32.totalorder %s3934_s23, %s3934_s23 }
  0x58   : > { %p3164_p10 = scmp.ne.s32.totalorder %s3934_s23, %s3163_s5  ;;  %p3172_p0 = scmp.lt.s32.totalorder %s3163_s5, %s3163_s5 }
  0x5a   : > { %p3166_p11 = pnand %p3164_p10, %p3946_p7  ;;  %p3173_p2 = por %p3172_p0, %p3171_p13 }
  0x5c   : > { %p3167_p12 = pneg %p3166_p11 }
  0x5e   : > { %p3174_p4 = pnand %p3173_p2, %p3167_p12 }
  0x60   : > { %3177 = shalt.err (!%p3174_p4)
}
  0x61   : > { %s3751_s0 = smov 192   ;;  %s3752_s2 = smov 12  }
  0x62   : > { %2955 = dma.hbm_to_vmem [thread:$0]  (!%p3930_p5), %s5277_s4, 6144, %s3934_s23, [#allocation11], %s3751_s0, %s3751_s0, %s3752_s2  }
  0x63   : > { %s5278_s30 = sld [smem:[#allocation185_spill]] }
  0x69   : > { %s3178_s24 = scalar_lea.hbm %s5278_s30, 1024 }
  0x6a   : > { %p3179_p6 = scmp.ne.s32.totalorder %s5278_s30, %s3178_s24  ;;  %p3185_p1 = scmp.lt.u32.totalorder %s3178_s24, %s5278_s30 }
  0x6c   : > { %p3181_p8 = pnand %p3179_p6, %p3946_p7 }
  0x6e   : > { %p3182_p9 = pneg %p3181_p8 }
  0x70   : > { %p3187_p3 = pnand %p3185_p1, %p3182_p9 }
  0x72   : > { %3190 = shalt.err (!%p3187_p3)
}
  0x73   : > { %s3191_s17 = scalar_lea.vmem %s622_s29, 1024  ;;  %p3199_p13 = scmp.lt.s32.totalorder %s622_s29, %s622_s29 }
  0x74   : > { %p3192_p10 = scmp.ne.s32.totalorder %s622_s29, %s3191_s17  ;;  %p3200_p0 = scmp.lt.s32.totalorder %s3191_s17, %s3191_s17 }
  0x76   : > { %p3194_p11 = pnand %p3192_p10, %p3946_p7  ;;  %p3201_p2 = por %p3200_p0, %p3199_p13 }
  0x78   : > { %p3195_p12 = pneg %p3194_p11 }
  0x7a   : > { %p3202_p4 = pnand %p3201_p2, %p3195_p12 }
  0x7c   : > { %3205 = shalt.err (!%p3202_p4)
}
  0x7d   : > { %s3753_s23 = smov 64   ;;  %s3754_s0 = smov 4  }
  0x7e   : > { %2961 = dma.hbm_to_vmem [thread:$0]  (!%p3930_p5), %s5278_s30, 1024, %s622_s29, [#allocation14], %s3753_s23, %s3753_s23, %s3754_s0  }
  0x7f   : > { %s3755_s2 = smov [#allocation16]   ;;  %s3756_s21 = smov [#allocation19]  }
  0x80   : > { %s645_s18 = sshll.u32 %s3755_s2, 4  ;;  %s669_s27 = sshll.u32 %s3756_s21, 4  ;;  %s646_s18 = int_to_ptr.vmem [resolvable:$true] %s645_s18  ;;  %s670_s27 = int_to_ptr.vmem [resolvable:$true] %s669_s27 }
  0x81   : > { %s5279_s7 = sld [smem:[#allocation187_spill]] }
  0x87   : > { %s3206_s5 = scalar_lea.hbm %s5279_s7, 1024 }
  0x88   : > { %p3207_p6 = scmp.ne.s32.totalorder %s5279_s7, %s3206_s5  ;;  %p3213_p1 = scmp.lt.u32.totalorder %s3206_s5, %s5279_s7 }
  0x8a   : > { %p3209_p8 = pnand %p3207_p6, %p3946_p7 }
  0x8c   : > { %p3210_p9 = pneg %p3209_p8 }
  0x8e   : > { %p3215_p3 = pnand %p3213_p1, %p3210_p9 }
  0x90   : > { %3218 = shalt.err (!%p3215_p3)
}
  0x91   : > { %s3219_s29 = scalar_lea.vmem %s646_s18, 1024  ;;  %p3227_p13 = scmp.lt.s32.totalorder %s646_s18, %s646_s18 }
  0x92   : > { %p3220_p10 = scmp.ne.s32.totalorder %s646_s18, %s3219_s29  ;;  %p3228_p0 = scmp.lt.s32.totalorder %s3219_s29, %s3219_s29 }
  0x94   : > { %p3222_p11 = pnand %p3220_p10, %p3946_p7  ;;  %p3229_p2 = por %p3228_p0, %p3227_p13 }
  0x96   : > { %p3223_p12 = pneg %p3222_p11 }
  0x98   : > { %p3230_p4 = pnand %p3229_p2, %p3223_p12 }
  0x9a   : > { %3233 = shalt.err (!%p3230_p4)
}
  0x9b   : > { %2967 = dma.hbm_to_vmem [thread:$0]  (!%p3930_p5), %s5279_s7, 1024, %s646_s18, [#allocation17], %s3753_s23, %s3753_s23, %s3754_s0  }
  0x9c   : > { %s5280_s9 = sld [smem:[#allocation189_spill]] }
  0xa2   : > { %s3234_s25 = scalar_lea.hbm %s5280_s9, 1024 }
  0xa3   : > { %p3235_p6 = scmp.ne.s32.totalorder %s5280_s9, %s3234_s25  ;;  %p3241_p1 = scmp.lt.u32.totalorder %s3234_s25, %s5280_s9 }
  0xa5   : > { %p3237_p8 = pnand %p3235_p6, %p3946_p7 }
  0xa7   : > { %p3238_p9 = pneg %p3237_p8 }
  0xa9   : > { %p3243_p3 = pnand %p3241_p1, %p3238_p9 }
  0xab   : > { %3246 = shalt.err (!%p3243_p3)
}
  0xac   : > { %s3247_s5 = scalar_lea.vmem %s670_s27, 1024  ;;  %p3255_p13 = scmp.lt.s32.totalorder %s670_s27, %s670_s27 }
  0xad   : > { %p3248_p10 = scmp.ne.s32.totalorder %s670_s27, %s3247_s5  ;;  %p3256_p0 = scmp.lt.s32.totalorder %s3247_s5, %s3247_s5 }
  0xaf   : > { %p3250_p11 = pnand %p3248_p10, %p3946_p7  ;;  %p3257_p2 = por %p3256_p0, %p3255_p13 }
  0xb1   : > { %p3251_p12 = pneg %p3250_p11 }
  0xb3   : > { %p3258_p4 = pnand %p3257_p2, %p3251_p12 }
  0xb5   : > { %3261 = shalt.err (!%p3258_p4)
}
  0xb6   : > { %2973 = dma.hbm_to_vmem [thread:$0]  (!%p3930_p5), %s5280_s9, 1024, %s670_s27, [#allocation20], %s3753_s23, %s3753_s23, %s3754_s0  }
  0xb7   : > { %s3757_s29 = smov [#allocation22]   ;;  %s3758_s3 = smov [#allocation25]  }
  0xb8   : > { %s693_s26 = sshll.u32 %s3757_s29, 4  ;;  %s717_s4 = sshll.u32 %s3758_s3, 4  ;;  %s694_s26 = int_to_ptr.vmem [resolvable:$true] %s693_s26  ;;  %s718_s4 = int_to_ptr.vmem [resolvable:$true] %s717_s4 }
  0xb9   : > { %s3262_s2 = scalar_lea.hbm %s5201_s11, 1024 }
  0xba   : > { %p3263_p6 = scmp.ne.s32.totalorder %s5201_s11, %s3262_s2  ;;  %p3269_p1 = scmp.lt.u32.totalorder %s3262_s2, %s5201_s11 }
  0xbc   : > { %p3265_p8 = pnand %p3263_p6, %p3946_p7 }
  0xbe   : > { %p3266_p9 = pneg %p3265_p8 }
  0xc0   : > { %p3271_p3 = pnand %p3269_p1, %p3266_p9 }
  0xc2   : > { %3274 = shalt.err (!%p3271_p3)
}
  0xc3   : > { %s3275_s27 = scalar_lea.vmem %s694_s26, 1024  ;;  %p3283_p13 = scmp.lt.s32.totalorder %s694_s26, %s694_s26 }
  0xc4   : > { %p3276_p10 = scmp.ne.s32.totalorder %s694_s26, %s3275_s27  ;;  %p3284_p0 = scmp.lt.s32.totalorder %s3275_s27, %s3275_s27 }
  0xc6   : > { %p3278_p11 = pnand %p3276_p10, %p3946_p7  ;;  %p3285_p2 = por %p3284_p0, %p3283_p13 }
  0xc8   : > { %p3279_p12 = pneg %p3278_p11 }
  0xca   : > { %p3286_p4 = pnand %p3285_p2, %p3279_p12 }
  0xcc   : > { %3289 = shalt.err (!%p3286_p4)
}
  0xcd   : > { %2979 = dma.hbm_to_vmem [thread:$0]  (!%p3930_p5), %s5201_s11, 1024, %s694_s26, [#allocation23], %s3753_s23, %s3753_s23, %s3754_s0  }
  0xce   : > { %s3290_s19 = scalar_lea.hbm %s5203_s13, 1024 }
  0xcf   : > { %p3291_p6 = scmp.ne.s32.totalorder %s5203_s13, %s3290_s19  ;;  %p3297_p1 = scmp.lt.u32.totalorder %s3290_s19, %s5203_s13 }
  0xd1   : > { %p3293_p8 = pnand %p3291_p6, %p3946_p7 }
  0xd3   : > { %p3294_p9 = pneg %p3293_p8 }
  0xd5   : > { %p3299_p3 = pnand %p3297_p1, %p3294_p9 }
  0xd7   : > { %3302 = shalt.err (!%p3299_p3)
}
  0xd8   : > { %s3303_s20 = scalar_lea.vmem %s718_s4, 1024  ;;  %p3311_p13 = scmp.lt.s32.totalorder %s718_s4, %s718_s4 }
  0xd9   : > { %p3304_p10 = scmp.ne.s32.totalorder %s718_s4, %s3303_s20  ;;  %p3312_p0 = scmp.lt.s32.totalorder %s3303_s20, %s3303_s20 }
  0xdb   : > { %p3306_p11 = pnand %p3304_p10, %p3946_p7  ;;  %p3313_p2 = por %p3312_p0, %p3311_p13 }
  0xdd   : > { %p3307_p12 = pneg %p3306_p11 }
  0xdf   : > { %p3314_p4 = pnand %p3313_p2, %p3307_p12 }
  0xe1   : > { %3317 = shalt.err (!%p3314_p4)
}
  0xe2   : > { %2985 = dma.hbm_to_vmem [thread:$0]  (!%p3930_p5), %s5203_s13, 1024, %s718_s4, [#allocation26], %s3753_s23, %s3753_s23, %s3754_s0  }
  0xe3   : > { %s3759_s27 = smov [#allocation28]   ;;  %s3760_s17 = smov [#allocation9]  }
  0xe4   : > { %s741_s18 = sshll.u32 %s3759_s27, 4  ;;  %s587_s29 = sshll.u32 %s3760_s17, 4  ;;  %s742_s18 = int_to_ptr.vmem [resolvable:$true] %s741_s18  ;;  %s588_s29 = int_to_ptr.vmem [resolvable:$true] %s587_s29 }
  0xe5   : > { %s3318_s25 = scalar_lea.hbm %s5205_s15, 1024 }
  0xe6   : > { %p3319_p6 = scmp.ne.s32.totalorder %s5205_s15, %s3318_s25  ;;  %p3325_p1 = scmp.lt.u32.totalorder %s3318_s25, %s5205_s15 }
  0xe8   : > { %p3321_p8 = pnand %p3319_p6, %p3946_p7 }
  0xea   : > { %p3322_p9 = pneg %p3321_p8 }
  0xec   : > { %p3327_p3 = pnand %p3325_p1, %p3322_p9 }
  0xee   : > { %3330 = shalt.err (!%p3327_p3)
}
  0xef   : > { %s3331_s4 = scalar_lea.vmem %s742_s18, 1024  ;;  %p3339_p13 = scmp.lt.s32.totalorder %s742_s18, %s742_s18 }
  0xf0   : > { %p3332_p10 = scmp.ne.s32.totalorder %s742_s18, %s3331_s4  ;;  %p3340_p0 = scmp.lt.s32.totalorder %s3331_s4, %s3331_s4 }
  0xf2   : > { %p3334_p11 = pnand %p3332_p10, %p3946_p7  ;;  %p3341_p2 = por %p3340_p0, %p3339_p13 }
  0xf4   : > { %p3335_p12 = pneg %p3334_p11 }
  0xf6   : > { %p3342_p4 = pnand %p3341_p2, %p3335_p12 }
  0xf8   : > { %3345 = shalt.err (!%p3342_p4)
}
  0xf9   : > { %2991 = dma.hbm_to_vmem [thread:$0]  (!%p3930_p5), %s5205_s15, 1024, %s742_s18, [#allocation29], %s3753_s23, %s3753_s23, %s3754_s0  }
  0xfa   : > { %s5281_s3 = sld [smem:[#allocation182_spill]] }
 0x100   : > { %s5282_s19 = smov %s5281_s3  ;;  %s3346_s25 = scalar_lea.hbm %s5281_s3, 128 }
 0x101   : > { %p3347_p6 = scmp.ne.s32.totalorder %s5282_s19, %s3346_s25  ;;  %p3353_p1 = scmp.lt.u32.totalorder %s3346_s25, %s5282_s19 }
 0x103   : > { %p3349_p8 = pnand %p3347_p6, %p3946_p7 }
 0x105   : > { %p3350_p9 = pneg %p3349_p8 }
 0x107   : > { %p3355_p3 = pnand %p3353_p1, %p3350_p9 }
 0x109   : > { %3358 = shalt.err (!%p3355_p3)
}
 0x10a   : > { %s3359_s4 = scalar_lea.vmem %s588_s29, 128  ;;  %p3367_p13 = scmp.lt.s32.totalorder %s588_s29, %s588_s29 }
 0x10b   : > { %p3360_p10 = scmp.ne.s32.totalorder %s588_s29, %s3359_s4  ;;  %p3368_p0 = scmp.lt.s32.totalorder %s3359_s4, %s3359_s4 }
 0x10d   : > { %p3362_p11 = pnand %p3360_p10, %p3946_p7  ;;  %p3369_p2 = por %p3368_p0, %p3367_p13 }
 0x10f   : > { %p3363_p12 = pneg %p3362_p11 }
 0x111   : > { %p3370_p4 = pnand %p3369_p2, %p3363_p12 }
 0x113   : > { %3373 = shalt.err (!%p3370_p4)
}
 0x114   : > { %2952 = dma.hbm_to_vmem [thread:$0]  (!%p3930_p5), %s5282_s19, 128, %s588_s29, [#allocation8]  }
 0x115   : > { %s3761_s18 = smov [#allocation12]   ;;  %s3762_s5 = smov [#allocation15]  }
 0x116   : > { %s611_s26 = sshll.u32 %s3761_s18, 4  ;;  %s635_s27 = sshll.u32 %s3762_s5, 4  ;;  %s612_s26 = int_to_ptr.vmem [resolvable:$true] %s611_s26  ;;  %s636_s27 = int_to_ptr.vmem [resolvable:$true] %s635_s27 }
 0x117   : > { %s5283_s25 = sld [smem:[#allocation184_spill]] }
 0x11d   : > { %s5284_s21 = smov %s5283_s25  ;;  %s3374_s2 = scalar_lea.hbm %s5283_s25, 48 }
 0x11e   : > { %p3375_p6 = scmp.ne.s32.totalorder %s5284_s21, %s3374_s2  ;;  %p3381_p1 = scmp.lt.u32.totalorder %s3374_s2, %s5284_s21 }
 0x120   : > { %p3377_p8 = pnand %p3375_p6, %p3946_p7 }
 0x122   : > { %p3378_p9 = pneg %p3377_p8 }
 0x124   : > { %p3383_p3 = pnand %p3381_p1, %p3378_p9 }
 0x126   : > { %3386 = shalt.err (!%p3383_p3)
}
 0x127   : > { %s3387_s29 = scalar_lea.vmem %s612_s26, 48  ;;  %s3394_s0 = scalar_lea.vmem %s612_s26, 64 }
 0x128   : > { %p3388_p10 = scmp.ne.s32.totalorder %s612_s26, %s3387_s29  ;;  %p3395_p13 = scmp.lt.s32.totalorder %s612_s26, %s612_s26 }
 0x129   : > { %p3396_p0 = scmp.lt.s32.totalorder %s3394_s0, %s3387_s29 }
 0x12a   : > { %p3390_p11 = pnand %p3388_p10, %p3946_p7 }
 0x12b   : > { %p3397_p2 = por %p3396_p0, %p3395_p13 }
 0x12c   : > { %p3391_p12 = pneg %p3390_p11 }
 0x12e   : > { %p3398_p4 = pnand %p3397_p2, %p3391_p12 }
 0x130   : > { %3401 = shalt.err (!%p3398_p4)
}
 0x131   : > { %2958 = dma.hbm_to_vmem [thread:$0]  (!%p3930_p5), %s5284_s21, 48, %s612_s26, [#allocation11]  }
 0x132   : > { %s5285_s6 = sld [smem:[#allocation186_spill]] }
 0x138   : > { %s3402_s25 = scalar_lea.hbm %s5285_s6, 16 }
 0x139   : > { %p3403_p6 = scmp.ne.s32.totalorder %s5285_s6, %s3402_s25  ;;  %p3409_p1 = scmp.lt.u32.totalorder %s3402_s25, %s5285_s6 }
 0x13b   : > { %p3405_p8 = pnand %p3403_p6, %p3946_p7 }
 0x13d   : > { %p3406_p9 = pneg %p3405_p8 }
 0x13f   : > { %p3411_p3 = pnand %p3409_p1, %p3406_p9 }
 0x141   : > { %3414 = shalt.err (!%p3411_p3)
}
 0x142   : > { %s3415_s23 = scalar_lea.vmem %s636_s27, 16  ;;  %s3422_s26 = scalar_lea.vmem %s636_s27, 32 }
 0x143   : > { %p3416_p10 = scmp.ne.s32.totalorder %s636_s27, %s3415_s23  ;;  %p3423_p13 = scmp.lt.s32.totalorder %s636_s27, %s636_s27 }
 0x144   : > { %p3424_p0 = scmp.lt.s32.totalorder %s3422_s26, %s3415_s23 }
 0x145   : > { %p3418_p11 = pnand %p3416_p10, %p3946_p7 }
 0x146   : > { %p3425_p2 = por %p3424_p0, %p3423_p13 }
 0x147   : > { %p3419_p12 = pneg %p3418_p11 }
 0x149   : > { %p3426_p4 = pnand %p3425_p2, %p3419_p12 }
 0x14b   : > { %3429 = shalt.err (!%p3426_p4)
}
 0x14c   : > { %2964 = dma.hbm_to_vmem [thread:$0]  (!%p3930_p5), %s5285_s6, 16, %s636_s27, [#allocation14]  }
 0x14d   : > { %s3763_s18 = smov [#allocation18]   ;;  %s3764_s17 = smov [#allocation21]  }
 0x14e   : > { %s659_s5 = sshll.u32 %s3763_s18, 4  ;;  %s683_s3 = sshll.u32 %s3764_s17, 4  ;;  %s660_s5 = int_to_ptr.vmem [resolvable:$true] %s659_s5  ;;  %s684_s3 = int_to_ptr.vmem [resolvable:$true] %s683_s3 }
 0x14f   : > { %s5286_s8 = sld [smem:[#allocation188_spill]] }
 0x155   : > { %s3430_s24 = scalar_lea.hbm %s5286_s8, 16 }
 0x156   : > { %p3431_p6 = scmp.ne.s32.totalorder %s5286_s8, %s3430_s24  ;;  %p3437_p1 = scmp.lt.u32.totalorder %s3430_s24, %s5286_s8 }
 0x158   : > { %p3433_p8 = pnand %p3431_p6, %p3946_p7 }
 0x15a   : > { %p3434_p9 = pneg %p3433_p8 }
 0x15c   : > { %p3439_p3 = pnand %p3437_p1, %p3434_p9 }
 0x15e   : > { %3442 = shalt.err (!%p3439_p3)
}
 0x15f   : > { %s3443_s27 = scalar_lea.vmem %s660_s5, 16  ;;  %s3450_s29 = scalar_lea.vmem %s660_s5, 32 }
 0x160   : > { %p3444_p10 = scmp.ne.s32.totalorder %s660_s5, %s3443_s27  ;;  %p3451_p13 = scmp.lt.s32.totalorder %s660_s5, %s660_s5 }
 0x161   : > { %p3452_p0 = scmp.lt.s32.totalorder %s3450_s29, %s3443_s27 }
 0x162   : > { %p3446_p11 = pnand %p3444_p10, %p3946_p7 }
 0x163   : > { %p3453_p2 = por %p3452_p0, %p3451_p13 }
 0x164   : > { %p3447_p12 = pneg %p3446_p11 }
 0x166   : > { %p3454_p4 = pnand %p3453_p2, %p3447_p12 }
 0x168   : > { %3457 = shalt.err (!%p3454_p4)
}
 0x169   : > { %2970 = dma.hbm_to_vmem [thread:$0]  (!%p3930_p5), %s5286_s8, 16, %s660_s5, [#allocation17]  }
 0x16a   : > { %s3458_s2 = scalar_lea.hbm %s5200_s10, 16 }
 0x16b   : > { %p3459_p6 = scmp.ne.s32.totalorder %s5200_s10, %s3458_s2  ;;  %p3465_p1 = scmp.lt.u32.totalorder %s3458_s2, %s5200_s10 }
 0x16d   : > { %p3461_p8 = pnand %p3459_p6, %p3946_p7 }
 0x16f   : > { %p3462_p9 = pneg %p3461_p8 }
 0x171   : > { %p3467_p3 = pnand %p3465_p1, %p3462_p9 }
 0x173   : > { %3470 = shalt.err (!%p3467_p3)
}
 0x174   : > { %s3471_s26 = scalar_lea.vmem %s684_s3, 16  ;;  %s3478_s5 = scalar_lea.vmem %s684_s3, 32 }
 0x175   : > { %p3472_p10 = scmp.ne.s32.totalorder %s684_s3, %s3471_s26  ;;  %p3479_p13 = scmp.lt.s32.totalorder %s684_s3, %s684_s3 }
 0x176   : > { %p3480_p0 = scmp.lt.s32.totalorder %s3478_s5, %s3471_s26 }
 0x177   : > { %p3474_p11 = pnand %p3472_p10, %p3946_p7 }
 0x178   : > { %p3481_p2 = por %p3480_p0, %p3479_p13 }
 0x179   : > { %p3475_p12 = pneg %p3474_p11 }
 0x17b   : > { %p3482_p4 = pnand %p3481_p2, %p3475_p12 }
 0x17d   : > { %3485 = shalt.err (!%p3482_p4)
}
 0x17e   : > { %2976 = dma.hbm_to_vmem [thread:$0]  (!%p3930_p5), %s5200_s10, 16, %s684_s3, [#allocation20]  }
 0x17f   : > { %s3765_s0 = smov [#allocation24]   ;;  %s3766_s17 = smov [#allocation27]  }
 0x180   : > { %s707_s18 = sshll.u32 %s3765_s0, 4  ;;  %s731_s25 = sshll.u32 %s3766_s17, 4  ;;  %s708_s18 = int_to_ptr.vmem [resolvable:$true] %s707_s18  ;;  %s732_s25 = int_to_ptr.vmem [resolvable:$true] %s731_s25 }
 0x181   : > { %s3486_s20 = scalar_lea.hbm %s5202_s12, 16 }
 0x182   : > { %p3487_p6 = scmp.ne.s32.totalorder %s5202_s12, %s3486_s20  ;;  %p3493_p1 = scmp.lt.u32.totalorder %s3486_s20, %s5202_s12 }
 0x184   : > { %p3489_p8 = pnand %p3487_p6, %p3946_p7 }
 0x186   : > { %p3490_p9 = pneg %p3489_p8 }
 0x188   : > { %p3495_p3 = pnand %p3493_p1, %p3490_p9 }
 0x18a   : > { %3498 = shalt.err (!%p3495_p3)
}
 0x18b   : > { %s3499_s3 = scalar_lea.vmem %s708_s18, 16  ;;  %s3506_s27 = scalar_lea.vmem %s708_s18, 32 }
 0x18c   : > { %p3500_p10 = scmp.ne.s32.totalorder %s708_s18, %s3499_s3  ;;  %p3507_p13 = scmp.lt.s32.totalorder %s708_s18, %s708_s18 }
 0x18d   : > { %p3508_p0 = scmp.lt.s32.totalorder %s3506_s27, %s3499_s3 }
 0x18e   : > { %p3502_p11 = pnand %p3500_p10, %p3946_p7 }
 0x18f   : > { %p3509_p2 = por %p3508_p0, %p3507_p13 }
 0x190   : > { %p3503_p12 = pneg %p3502_p11 }
 0x192   : > { %p3510_p4 = pnand %p3509_p2, %p3503_p12 }
 0x194   : > { %3513 = shalt.err (!%p3510_p4)
}
 0x195   : > { %2982 = dma.hbm_to_vmem [thread:$0]  (!%p3930_p5), %s5202_s12, 16, %s708_s18, [#allocation23]  }
 0x196   : > { %s3514_s24 = scalar_lea.hbm %s5204_s14, 16 }
 0x197   : > { %p3515_p6 = scmp.ne.s32.totalorder %s5204_s14, %s3514_s24  ;;  %p3521_p1 = scmp.lt.u32.totalorder %s3514_s24, %s5204_s14 }
 0x199   : > { %p3517_p8 = pnand %p3515_p6, %p3946_p7 }
 0x19b   : > { %p3518_p9 = pneg %p3517_p8 }
 0x19d   : > { %p3523_p3 = pnand %p3521_p1, %p3518_p9 }
 0x19f   : > { %3526 = shalt.err (!%p3523_p3)
}
 0x1a0   : > { %s3527_s5 = scalar_lea.vmem %s732_s25, 16  ;;  %s3534_s18 = scalar_lea.vmem %s732_s25, 32 }
 0x1a1   : > { %p3528_p10 = scmp.ne.s32.totalorder %s732_s25, %s3527_s5  ;;  %p3535_p13 = scmp.lt.s32.totalorder %s732_s25, %s732_s25 }
 0x1a2   : > { %p3536_p0 = scmp.lt.s32.totalorder %s3534_s18, %s3527_s5 }
 0x1a3   : > { %p3530_p11 = pnand %p3528_p10, %p3946_p7 }
 0x1a4   : > { %p3537_p2 = por %p3536_p0, %p3535_p13 }
 0x1a5   : > { %p3531_p12 = pneg %p3530_p11 }
 0x1a7   : > { %p3538_p4 = pnand %p3537_p2, %p3531_p12 }
 0x1a9   : > { %3541 = shalt.err (!%p3538_p4)
}
 0x1aa   : > { %2988 = dma.hbm_to_vmem [thread:$0]  (!%p3930_p5), %s5204_s14, 16, %s732_s25, [#allocation26]  }
 0x1ab   : > { %s3767_s29 = smov [#allocation30]   ;;  %s3542_s24 = scalar_lea.hbm %s5206_s16, 16 }
 0x1ac   : > { %s755_s0 = sshll.u32 %s3767_s29, 4  ;;  %p3543_p6 = scmp.ne.s32.totalorder %s5206_s16, %s3542_s24  ;;  %s756_s0 = int_to_ptr.vmem [resolvable:$true] %s755_s0 }
 0x1ad   : > { %p3549_p1 = scmp.lt.u32.totalorder %s3542_s24, %s5206_s16 }
 0x1ae   : > { %p3545_p8 = pnand %p3543_p6, %p3946_p7 }
 0x1b0   : > { %p3546_p9 = pneg %p3545_p8 }
 0x1b2   : > { %p3551_p3 = pnand %p3549_p1, %p3546_p9 }
 0x1b4   : > { %3554 = shalt.err (!%p3551_p3)
}
 0x1b5   : > { %s3555_s25 = scalar_lea.vmem %s756_s0, 16  ;;  %s3562_s5 = scalar_lea.vmem %s756_s0, 32 }
 0x1b6   : > { %p3556_p10 = scmp.ne.s32.totalorder %s756_s0, %s3555_s25  ;;  %p3563_p13 = scmp.lt.s32.totalorder %s756_s0, %s756_s0 }
 0x1b7   : > { %p3564_p0 = scmp.lt.s32.totalorder %s3562_s5, %s3555_s25 }
 0x1b8   : > { %p3558_p11 = pnand %p3556_p10, %p3946_p7 }
 0x1b9   : > { %p3565_p2 = por %p3564_p0, %p3563_p13 }
 0x1ba   : > { %p3559_p12 = pneg %p3558_p11 }
 0x1bc   : > { %p3566_p4 = pnand %p3565_p2, %p3559_p12 }
 0x1be   : > { %3569 = shalt.err (!%p3566_p4)
}
 0x1bf   : > { %s5287_s27 = sld [smem:[#allocation49_spill]]  ;;  %s5288_s29 = sld [smem:[#allocation47_spill]] }
 0x1c0   : > { %s5289_s17 = sld [smem:[#allocation46_spill]]  ;;  %s5290_s22 = sld [smem:[#allocation45_spill]] }
 0x1c1   : > { %s5291_s2 = sld [smem:[#allocation50_spill]]  ;;  %s2489_s24 = sadd.s32 4294967294, %s3746_s28  }
 0x1c2   : > { %2994 = dma.hbm_to_vmem [thread:$0]  (!%p3930_p5), %s5206_s16, 16, %s756_s0, [#allocation29]  }
 0x1c3   : > { %p78_p8 = scmp.eq.s32.totalorder %s3746_s28, 0  ;;  %s5293_s23 = sadd.s32 4294967295, %s3746_s28  }
 0x1c4   : > { %p518_p5 = scmp.eq.s32.totalorder %s5293_s23, 7  ;;  %p524_p13 = scmp.eq.s32.totalorder %s2489_s24, 7 }
 0x1c5   : > { %s58_s20 = sadd.s32 1, %s5287_s27  ;;  %s70_s1 = sadd.s32 1, %s5288_s29 }
 0x1c6   : > { %p59_p7 = scmp.ge.s32.totalorder %s58_s20, 8  ;;  %p77_p6 = scmp.ne.s32.totalorder %s5288_s29, %s5289_s17 }
 0x1c7   : > { %p83_p1 = scmp.ne.s32.totalorder %s5289_s17, %s5290_s22  ;;  %p5294_p10 = scmp.ne.s32.totalorder %s5291_s2, 0 }
 0x1c8   : > { %s5581_s20 = smov (%p59_p7, %s58_s20), 0  ;;  %p4264_p9 = por %p78_p8, %p77_p6 }
 0x1c9   : > { %s65_s0 = ssub.s32 %s5287_s27, %s5581_s20  ;;  %p4276_p11 = por %p5294_p10, %p83_p1 }
 0x1ca   : > { %p68_p3 = scmp.eq.s32.totalorder %s65_s0, 0  ;;  %p4280_p12 = por %p518_p5, %p77_p6 }
 0x1cb   : > { %p4287_p0 = por %p524_p13, %p83_p1  ;;  %p3022_p2 = scmp.lt.s32.totalorder %s3746_s28, 8 }
 0x1cc   : > { %s5296_s25 = scalar_select %p4280_p12, 1, 0 }
 0x1cd   : > { %s4285_s5 = scalar_select %p68_p3, %s5288_s29, %s70_s1  }
 0x1ce   : > { %s5297_s18 = scalar_select %p4287_p0, 1, 0 }
 0x1cf   : > { %s775_s3 = sand.u32 1, %s5288_s29   ;;  %s2509_s17 = sshll.u32 %s5287_s27, 7 }
 0x1d0   : > { %s2508_s22 = sshll.u32 %s775_s3, 3  ;;  %s5298_s23 = sld [smem:[#allocation180_spill]] }
 0x1d1   : > { %s779_s24 = scalar_lea.vmem [#allocation4], %s2508_s22  ;;  %p4301_p4 = pnand %p3022_p2, %p4264_p9 }
 0x1d2   : > { %s787_s1 = sshll.u32 %s779_s24, 4  ;;  %s776_s27 = scalar_lea.sflag [#allocation5], %s775_s3  ;;  %s4305_s1 = int_to_ptr.vmem [resolvable:$true] %s787_s1 }
 0x1d3   : > { %p3572_p6 = pneg %p4301_p4 }
 0x1d6   : > { %s4297_s6 = scalar_lea.hbm %s5298_s23, %s2509_s17  ;;  %s3575_s4 = scalar_lea.hbm %s5298_s23, 1024 }
 0x1d7   : > { %s3570_s29 = scalar_lea.hbm %s4297_s6, 128  ;;  %p3576_p9 = scmp.lt.u32.totalorder %s4297_s6, %s5298_s23 }
 0x1d8   : > { %p3571_p7 = scmp.ne.s32.totalorder %s4297_s6, %s3570_s29  ;;  %p3577_p5 = scmp.lt.u32.totalorder %s3575_s4, %s3570_s29 }
 0x1d9   : > { %p3579_p10 = scmp.lt.u32.totalorder %s3570_s29, %s4297_s6 }
 0x1da   : > { %p3573_p8 = pnand %p3572_p6, %p3571_p7  ;;  %p3578_p3 = por %p3577_p5, %p3576_p9 }
 0x1dc   : > { %p3574_p1 = pneg %p3573_p8  ;;  %p3580_p13 = por %p3579_p10, %p3578_p3 }
 0x1de   : > { %p3581_p2 = pnand %p3580_p13, %p3574_p1 }
 0x1e0   : > { %3584 = shalt.err (!%p3581_p2)
}
 0x1e1   : > { %s3585_s3 = scalar_lea.vmem %s4305_s1, 128  ;;  %s3768_s24 = smov [#allocation4]  }
 0x1e2   : > { %p3586_p7 = scmp.ne.s32.totalorder %s4305_s1, %s3585_s3  ;;  %s3590_s17 = sshll.u32 %s3768_s24, 4  ;;  %s3591_s17 = int_to_ptr.vmem [resolvable:$false] %s3590_s17 }
 0x1e3   : > { %s3592_s22 = scalar_lea.vmem %s3591_s17, 256  ;;  %p3593_p12 = scmp.lt.s32.totalorder %s4305_s1, %s3591_s17 }
 0x1e4   : > { %p3588_p8 = pnand %p3586_p7, %p3572_p6  ;;  %p3594_p9 = scmp.lt.s32.totalorder %s3592_s22, %s3585_s3 }
 0x1e6   : > { %p3589_p0 = pneg %p3588_p8  ;;  %p3595_p5 = por %p3594_p9, %p3593_p12 }
 0x1e8   : > { %p3596_p3 = pnand %p3595_p5, %p3589_p0 }
 0x1ea   : > { %3599 = shalt.err (!%p3596_p3)
}
 0x1eb   : > { %2998 = dma.hbm_to_vmem [thread:$0]  (!%p4301_p4), %s4297_s6, 128, %s4305_s1, %s776_s27  }
 0x1ec   : > { %s5300_s29 = sld [smem:[#allocation51_spill]] }
 0x1f2   : > { %p5301_p1 = scmp.ne.s32.totalorder %s5300_s29, 0 }
 0x1f4   : > { %796 = sbr.rel (%p5301_p1) target bundleno = 1668 (0x684), region = 100 }
 0x1fb   : > { %s5302_s4 = sld [smem:[#allocation46_spill]] }
 0x201   : > { %s4335_s2 = sand.u32 1, %s5302_s4  }
 0x202   : > { %s4338_s0 = sshll.u32 %s4335_s2, 3  ;;  %s799_s3 = scalar_lea.sflag [#allocation5], %s4335_s2 }
 0x203   : > { %3681 = dma.done.wait (%p4276_p11), %s799_s3, 128  }
 0x204   : > { %3683 = vsyncadd (%p4276_p11), %s799_s3, 4294967168  ;;  %s5303_s6 = sld [smem:[#allocation50_spill]] }
 0x20a   : > { %p5304_p12 = scmp.ne.s32.totalorder %s5303_s6, 0 }
 0x20c   : > { %3685 = dma.done.wait (%p5304_p12), [#allocation8], 256  }
 0x20d   : > { %3687 = vsyncadd (%p5304_p12), [#allocation8], 4294967040 }
 0x20e   : > { %3689 = dma.done.wait (%p5304_p12), [#allocation11], 6192  }
 0x20f   : > { %3691 = vsyncadd (%p5304_p12), [#allocation11], 4294961104 }
 0x210   : > { %3693 = dma.done.wait (%p5304_p12), [#allocation14], 1040  }
 0x211   : > { %3695 = vsyncadd (%p5304_p12), [#allocation14], 4294966256 }
 0x212   : > { %3697 = dma.done.wait (%p5304_p12), [#allocation17], 1040  }
 0x213   : > { %3699 = vsyncadd (%p5304_p12), [#allocation17], 4294966256 }
 0x214   : > { %3701 = dma.done.wait (%p5304_p12), [#allocation20], 1040  }
 0x215   : > { %3703 = vsyncadd (%p5304_p12), [#allocation20], 4294966256 }
 0x216   : > { %3705 = dma.done.wait (%p5304_p12), [#allocation23], 1040  }
 0x217   : > { %3707 = vsyncadd (%p5304_p12), [#allocation23], 4294966256 }
 0x218   : > { %3709 = dma.done.wait (%p5304_p12), [#allocation26], 1040  }
 0x219   : > { %3711 = vsyncadd (%p5304_p12), [#allocation26], 4294966256 }
 0x21a   : > { %3713 = dma.done.wait (%p5304_p12), [#allocation29], 1040  }
 0x21b   : > { %3715 = vsyncadd (%p5304_p12), [#allocation29], 4294966256  ;;  %v4378_v0 = vld [vmem:[#allocation10] sm:$0xff]  ;;  %v4380_v1 = vld [vmem:[#allocation10 + $0x8] sm:$0xf]  ;;  %s5416_s1 = sld [smem:[#allocation190_spill]] }
 0x21c   : > { %v4382_v2 = vld [vmem:[#allocation10 + $0xc] sm:$0xff]  ;;  %v4384_v3 = vld [vmem:[#allocation10 + $0x14] sm:$0xf]  ;;  %v4386_v4 = vld [vmem:[#allocation10 + $0x18] sm:$0xff]  ;;  %s5433_s29 = sld [smem:[#allocation191_spill]]  ;;  %s5435_s3 = sld [smem:[#allocation192_spill]] }
 0x21d   : > { %v4388_v5 = vld [vmem:[#allocation10 + $0x20] sm:$0xf]  ;;  %v4390_v6 = vld [vmem:[#allocation10 + $0x24] sm:$0xff]  ;;  %v4392_v7 = vld [vmem:[#allocation10 + $0x2c] sm:$0xf]  ;;  %s929_s9 = scalar_lea.vmem [#allocation32], %s4338_s0 }
 0x21e   : > { %v4394_v8 = vld [vmem:[#allocation10 + $0x30] sm:$0xff]  ;;  %v4396_v9 = vld [vmem:[#allocation10 + $0x38] sm:$0xf]  ;;  %v4398_v10 = vld [vmem:[#allocation10 + $0x3c] sm:$0xff]  ;;  %s5436_s24 = sld [smem:[#allocation48_spill]] }
 0x21f   : > { %v4400_v11 = vld [vmem:[#allocation10 + $0x44] sm:$0xf]  ;;  %v4402_v12 = vld [vmem:[#allocation10 + $0x48] sm:$0xff]  ;;  %v4404_v13 = vld [vmem:[#allocation10 + $0x50] sm:$0xf] }
 0x220   : > { %v4406_v14 = vld [vmem:[#allocation10 + $0x54] sm:$0xff]  ;;  %v4408_v15 = vld [vmem:[#allocation10 + $0x5c] sm:$0xf]  ;;  %v4410_v16 = vld [vmem:[#allocation10 + $0x60] sm:$0xff] }
 0x221   : > { %v4412_v17 = vld [vmem:[#allocation10 + $0x68] sm:$0xf]  ;;  %v4414_v18 = vld [vmem:[#allocation10 + $0x6c] sm:$0xff]  ;;  %v4416_v19 = vld [vmem:[#allocation10 + $0x74] sm:$0xf] }
 0x222   : > { %v4418_v20 = vld [vmem:[#allocation10 + $0x78] sm:$0xff]  ;;  %v4420_v21 = vld [vmem:[#allocation10 + $0x80] sm:$0xf]  ;;  %v4422_v22 = vld [vmem:[#allocation10 + $0x84] sm:$0xff] }
 0x223   : > { %v4424_v23 = vld [vmem:[#allocation10 + $0x8c] sm:$0xf]  ;;  %v4426_v24 = vld [vmem:[#allocation10 + $0x90] sm:$0xff]  ;;  %v4428_v25 = vld [vmem:[#allocation10 + $0x98] sm:$0xf] }
 0x224   : > { %v4430_v26 = vld [vmem:[#allocation10 + $0x9c] sm:$0xff]  ;;  %v4432_v27 = vld [vmem:[#allocation10 + $0xa4] sm:$0xf]  ;;  %v4434_v28 = vld [vmem:[#allocation10 + $0xa8] sm:$0xff]  ;;  %p2530_p11 = scmp.ne.s32.totalorder %s5436_s24, 0 }
 0x225   : > { %v4436_v29 = vld [vmem:[#allocation10 + $0xb0] sm:$0xf]  ;;  %v4438_v30 = vld [vmem:[#allocation10 + $0xb4] sm:$0xff]  ;;  %v4440_v31 = vld [vmem:[#allocation10 + $0xbc] sm:$0xf] }
 0x226   : > { %v4442_v32 = vld [vmem:[#allocation10 + $0xc0] sm:$0xff]  ;;  %v4444_v33 = vld [vmem:[#allocation10 + $0xc8] sm:$0xf]  ;;  %v4446_v34 = vld [vmem:[#allocation10 + $0xcc] sm:$0xff] }
 0x227   : > { %v4448_v35 = vld [vmem:[#allocation10 + $0xd4] sm:$0xf]  ;;  %v4450_v36 = vld [vmem:[#allocation10 + $0xd8] sm:$0xff]  ;;  %v4452_v37 = vld [vmem:[#allocation10 + $0xe0] sm:$0xf] }
 0x228   : > { %v4454_v38 = vld [vmem:[#allocation10 + $0xe4] sm:$0xff]  ;;  %v4456_v39 = vld [vmem:[#allocation10 + $0xec] sm:$0xf]  ;;  %v4458_v40 = vld [vmem:[#allocation10 + $0xf0] sm:$0xff] }
 0x229   : > { %5305 = vst [vmem:[#allocation52_spill] sm:$0xff] %v4458_v40  ;;  %v4460_v41 = vld [vmem:[#allocation10 + $0xf8] sm:$0xf]  ;;  %v4462_v42 = vld [vmem:[#allocation10 + $0xfc] sm:$0xff]  ;;  %v4464_v43 = vld [vmem:[#allocation10 + $0x104] sm:$0xf] }
 0x22a   : > { %v4466_v44 = vld [vmem:[#allocation10 + $0x108] sm:$0xff]  ;;  %v4468_v45 = vld [vmem:[#allocation10 + $0x110] sm:$0xf]  ;;  %v4470_v46 = vld [vmem:[#allocation10 + $0x114] sm:$0xff] }
 0x22b   : > { %5306 = vst [vmem:[#allocation53_spill] sm:$0xff] %v4466_v44  ;;  %5307 = vst [vmem:[#allocation54_spill] sm:$0xff] %v4470_v46  ;;  %v4472_v47 = vld [vmem:[#allocation10 + $0x11c] sm:$0xf]  ;;  %v4474_v48 = vld [vmem:[#allocation10 + $0x120] sm:$0xff] }
 0x22c   : > { %5308 = vst [vmem:[#allocation55_spill] sm:$0xff] %v4474_v48  ;;  %v4476_v49 = vld [vmem:[#allocation10 + $0x128] sm:$0xf]  ;;  %v4478_v50 = vld [vmem:[#allocation10 + $0x12c] sm:$0xff]  ;;  %v4480_v51 = vld [vmem:[#allocation10 + $0x134] sm:$0xf] }
 0x22d   : > { %5309 = vst [vmem:[#allocation56_spill] sm:$0xff] %v4478_v50  ;;  %v4482_v52 = vld [vmem:[#allocation10 + $0x138] sm:$0xff]  ;;  %v4484_v53 = vld [vmem:[#allocation10 + $0x140] sm:$0xf]  ;;  %v4486_v54 = vld [vmem:[#allocation10 + $0x144] sm:$0xff] }
 0x22e   : > { %5310 = vst [vmem:[#allocation57_spill] sm:$0xff] %v4482_v52  ;;  %5311 = vst [vmem:[#allocation58_spill] sm:$0xff] %v4486_v54  ;;  %v4488_v55 = vld [vmem:[#allocation10 + $0x14c] sm:$0xf]  ;;  %v4490_v56 = vld [vmem:[#allocation10 + $0x150] sm:$0xff] }
 0x22f   : > { %5312 = vst [vmem:[#allocation59_spill] sm:$0xff] %v4490_v56  ;;  %v4492_v57 = vld [vmem:[#allocation10 + $0x158] sm:$0xf]  ;;  %v4494_v58 = vld [vmem:[#allocation10 + $0x15c] sm:$0xff]  ;;  %v4496_v59 = vld [vmem:[#allocation10 + $0x164] sm:$0xf] }
 0x230   : > { %5313 = vst [vmem:[#allocation60_spill] sm:$0xff] %v4494_v58  ;;  %v4498_v60 = vld [vmem:[#allocation10 + $0x168] sm:$0xff]  ;;  %v4500_v61 = vld [vmem:[#allocation10 + $0x170] sm:$0xf]  ;;  %v4502_v62 = vld [vmem:[#allocation10 + $0x174] sm:$0xff] }
 0x231   : > { %5314 = vst [vmem:[#allocation61_spill] sm:$0xff] %v4498_v60  ;;  %5315 = vst [vmem:[#allocation62_spill] sm:$0xff] %v4502_v62  ;;  %v4504_v63 = vld [vmem:[#allocation10 + $0x17c] sm:$0xf]  ;;  %v4506_v52 = vld [vmem:[#allocation12] sm:$0x7] }
 0x232   : > { %5316 = vst [vmem:[#allocation63_spill] sm:$0xff] %v4506_v52  ;;  %v4508_v54 = vld [vmem:[#allocation13] sm:$0xf]  ;;  %v4510_v48 = vld [vmem:[#allocation13 + $0x4] sm:$0xf] }
 0x233   : > { %5317 = vst [vmem:[#allocation64_spill] sm:$0xff] %v4508_v54  ;;  %5318 = vst [vmem:[#allocation65_spill] sm:$0xff] %v4510_v48  ;;  %v4512_v56 = vld [vmem:[#allocation13 + $0x8] sm:$0xf]  ;;  %v4514_v50 = vld [vmem:[#allocation13 + $0xc] sm:$0xf] }
 0x234   : > { %5319 = vst [vmem:[#allocation66_spill] sm:$0xff] %v4512_v56  ;;  %5320 = vst [vmem:[#allocation67_spill] sm:$0xff] %v4514_v50  ;;  %v4516_v58 = vld [vmem:[#allocation13 + $0x10] sm:$0xf]  ;;  %v4518_v44 = vld [vmem:[#allocation13 + $0x14] sm:$0xf] }
 0x235   : > { %5321 = vst [vmem:[#allocation68_spill] sm:$0xff] %v4516_v58  ;;  %5322 = vst [vmem:[#allocation69_spill] sm:$0xff] %v4518_v44  ;;  %v4520_v60 = vld [vmem:[#allocation13 + $0x18] sm:$0xf]  ;;  %v4522_v46 = vld [vmem:[#allocation13 + $0x1c] sm:$0xf] }
 0x236   : > { %5323 = vst [vmem:[#allocation70_spill] sm:$0xff] %v4520_v60  ;;  %5324 = vst [vmem:[#allocation71_spill] sm:$0xff] %v4522_v46  ;;  %v4524_v62 = vld [vmem:[#allocation13 + $0x20] sm:$0xf]  ;;  %v4526_v40 = vld [vmem:[#allocation13 + $0x24] sm:$0xf] }
 0x237   : > { %5325 = vst [vmem:[#allocation72_spill] sm:$0xff] %v4524_v62  ;;  %5326 = vst [vmem:[#allocation73_spill] sm:$0xff] %v4526_v40  ;;  %v4528_v52 = vld [vmem:[#allocation13 + $0x28] sm:$0xf]  ;;  %v4530_v54 = vld [vmem:[#allocation13 + $0x2c] sm:$0xf] }
 0x238   : > { %5327 = vst [vmem:[#allocation74_spill] sm:$0xff] %v4528_v52  ;;  %5328 = vst [vmem:[#allocation75_spill] sm:$0xff] %v4530_v54  ;;  %v4532_v48 = vld [vmem:[#allocation13 + $0x30] sm:$0xf]  ;;  %v4534_v56 = vld [vmem:[#allocation13 + $0x34] sm:$0xf] }
 0x239   : > { %5329 = vst [vmem:[#allocation76_spill] sm:$0xff] %v4532_v48  ;;  %5330 = vst [vmem:[#allocation77_spill] sm:$0xff] %v4534_v56  ;;  %v4536_v50 = vld [vmem:[#allocation13 + $0x38] sm:$0xf]  ;;  %v4538_v58 = vld [vmem:[#allocation13 + $0x3c] sm:$0xf] }
 0x23a   : > { %5331 = vst [vmem:[#allocation78_spill] sm:$0xff] %v4536_v50  ;;  %5332 = vst [vmem:[#allocation79_spill] sm:$0xff] %v4538_v58  ;;  %v4540_v44 = vld [vmem:[#allocation15] ss:$0 sm:$0xff]  ;;  %v4542_v60 = vld [vmem:[#allocation16] sm:$0xf] }
 0x23b   : > { %5333 = vst [vmem:[#allocation80_spill] sm:$0xff] %v4540_v44  ;;  %5334 = vst [vmem:[#allocation81_spill] sm:$0xff] %v4542_v60  ;;  %v4544_v46 = vld [vmem:[#allocation16 + $0x4] sm:$0xf]  ;;  %v4546_v62 = vld [vmem:[#allocation16 + $0x8] sm:$0xf] }
 0x23c   : > { %5335 = vst [vmem:[#allocation82_spill] sm:$0xff] %v4544_v46  ;;  %5336 = vst [vmem:[#allocation83_spill] sm:$0xff] %v4546_v62  ;;  %v4548_v40 = vld [vmem:[#allocation16 + $0xc] sm:$0xf]  ;;  %v4550_v52 = vld [vmem:[#allocation16 + $0x10] sm:$0xf] }
 0x23d   : > { %5337 = vst [vmem:[#allocation84_spill] sm:$0xff] %v4548_v40  ;;  %5338 = vst [vmem:[#allocation85_spill] sm:$0xff] %v4550_v52  ;;  %v4552_v54 = vld [vmem:[#allocation16 + $0x14] sm:$0xf]  ;;  %v4554_v48 = vld [vmem:[#allocation16 + $0x18] sm:$0xf] }
 0x23e   : > { %5339 = vst [vmem:[#allocation86_spill] sm:$0xff] %v4552_v54  ;;  %5340 = vst [vmem:[#allocation87_spill] sm:$0xff] %v4554_v48  ;;  %v4556_v56 = vld [vmem:[#allocation16 + $0x1c] sm:$0xf]  ;;  %v4558_v50 = vld [vmem:[#allocation16 + $0x20] sm:$0xf] }
 0x23f   : > { %5341 = vst [vmem:[#allocation88_spill] sm:$0xff] %v4556_v56  ;;  %5342 = vst [vmem:[#allocation89_spill] sm:$0xff] %v4558_v50  ;;  %v4560_v58 = vld [vmem:[#allocation16 + $0x24] sm:$0xf]  ;;  %v4562_v44 = vld [vmem:[#allocation16 + $0x28] sm:$0xf] }
 0x240   : > { %5343 = vst [vmem:[#allocation90_spill] sm:$0xff] %v4560_v58  ;;  %5344 = vst [vmem:[#allocation91_spill] sm:$0xff] %v4562_v44  ;;  %v4564_v60 = vld [vmem:[#allocation16 + $0x2c] sm:$0xf]  ;;  %v4566_v46 = vld [vmem:[#allocation16 + $0x30] sm:$0xf] }
 0x241   : > { %5345 = vst [vmem:[#allocation92_spill] sm:$0xff] %v4564_v60  ;;  %5346 = vst [vmem:[#allocation93_spill] sm:$0xff] %v4566_v46  ;;  %v4568_v62 = vld [vmem:[#allocation16 + $0x34] sm:$0xf]  ;;  %v4570_v40 = vld [vmem:[#allocation16 + $0x38] sm:$0xf] }
 0x242   : > { %5347 = vst [vmem:[#allocation94_spill] sm:$0xff] %v4568_v62  ;;  %5348 = vst [vmem:[#allocation95_spill] sm:$0xff] %v4570_v40  ;;  %v4572_v52 = vld [vmem:[#allocation16 + $0x3c] sm:$0xf]  ;;  %v4574_v54 = vld [vmem:[#allocation18] ss:$0 sm:$0xff] }
 0x243   : > { %5349 = vst [vmem:[#allocation96_spill] sm:$0xff] %v4572_v52  ;;  %5350 = vst [vmem:[#allocation97_spill] sm:$0xff] %v4574_v54  ;;  %v4576_v48 = vld [vmem:[#allocation19] sm:$0xf]  ;;  %v4578_v56 = vld [vmem:[#allocation19 + $0x4] sm:$0xf] }
 0x244   : > { %5351 = vst [vmem:[#allocation98_spill] sm:$0xff] %v4576_v48  ;;  %5352 = vst [vmem:[#allocation99_spill] sm:$0xff] %v4578_v56  ;;  %v4580_v50 = vld [vmem:[#allocation19 + $0x8] sm:$0xf]  ;;  %v4582_v58 = vld [vmem:[#allocation19 + $0xc] sm:$0xf] }
 0x245   : > { %5353 = vst [vmem:[#allocation100_spill] sm:$0xff] %v4580_v50  ;;  %5354 = vst [vmem:[#allocation101_spill] sm:$0xff] %v4582_v58  ;;  %v4584_v44 = vld [vmem:[#allocation19 + $0x10] sm:$0xf]  ;;  %v4586_v60 = vld [vmem:[#allocation19 + $0x14] sm:$0xf] }
 0x246   : > { %5355 = vst [vmem:[#allocation102_spill] sm:$0xff] %v4584_v44  ;;  %5356 = vst [vmem:[#allocation103_spill] sm:$0xff] %v4586_v60  ;;  %v4588_v46 = vld [vmem:[#allocation19 + $0x18] sm:$0xf]  ;;  %v4590_v62 = vld [vmem:[#allocation19 + $0x1c] sm:$0xf] }
 0x247   : > { %5357 = vst [vmem:[#allocation104_spill] sm:$0xff] %v4588_v46  ;;  %5358 = vst [vmem:[#allocation105_spill] sm:$0xff] %v4590_v62  ;;  %v4592_v40 = vld [vmem:[#allocation19 + $0x20] sm:$0xf]  ;;  %v4594_v52 = vld [vmem:[#allocation19 + $0x24] sm:$0xf] }
 0x248   : > { %5359 = vst [vmem:[#allocation106_spill] sm:$0xff] %v4592_v40  ;;  %5360 = vst [vmem:[#allocation107_spill] sm:$0xff] %v4594_v52  ;;  %v4596_v54 = vld [vmem:[#allocation19 + $0x28] sm:$0xf]  ;;  %v4598_v48 = vld [vmem:[#allocation19 + $0x2c] sm:$0xf] }
 0x249   : > { %5361 = vst [vmem:[#allocation108_spill] sm:$0xff] %v4596_v54  ;;  %5362 = vst [vmem:[#allocation109_spill] sm:$0xff] %v4598_v48  ;;  %v4600_v56 = vld [vmem:[#allocation19 + $0x30] sm:$0xf]  ;;  %v4602_v50 = vld [vmem:[#allocation19 + $0x34] sm:$0xf] }
 0x24a   : > { %5363 = vst [vmem:[#allocation110_spill] sm:$0xff] %v4600_v56  ;;  %5364 = vst [vmem:[#allocation111_spill] sm:$0xff] %v4602_v50  ;;  %v4604_v58 = vld [vmem:[#allocation19 + $0x38] sm:$0xf]  ;;  %v4606_v44 = vld [vmem:[#allocation19 + $0x3c] sm:$0xf] }
 0x24b   : > { %5365 = vst [vmem:[#allocation112_spill] sm:$0xff] %v4604_v58  ;;  %5366 = vst [vmem:[#allocation113_spill] sm:$0xff] %v4606_v44  ;;  %v4608_v60 = vld [vmem:[#allocation21] ss:$0 sm:$0xff]  ;;  %v4610_v46 = vld [vmem:[#allocation22] sm:$0xf] }
 0x24c   : > { %5367 = vst [vmem:[#allocation114_spill] sm:$0xff] %v4608_v60  ;;  %5368 = vst [vmem:[#allocation115_spill] sm:$0xff] %v4610_v46  ;;  %v4612_v62 = vld [vmem:[#allocation22 + $0x4] sm:$0xf]  ;;  %v4614_v40 = vld [vmem:[#allocation22 + $0x8] sm:$0xf] }
 0x24d   : > { %5369 = vst [vmem:[#allocation116_spill] sm:$0xff] %v4612_v62  ;;  %5370 = vst [vmem:[#allocation117_spill] sm:$0xff] %v4614_v40  ;;  %v4616_v52 = vld [vmem:[#allocation22 + $0xc] sm:$0xf]  ;;  %v4618_v54 = vld [vmem:[#allocation22 + $0x10] sm:$0xf] }
 0x24e   : > { %5371 = vst [vmem:[#allocation118_spill] sm:$0xff] %v4616_v52  ;;  %5372 = vst [vmem:[#allocation119_spill] sm:$0xff] %v4618_v54  ;;  %v4620_v48 = vld [vmem:[#allocation22 + $0x14] sm:$0xf]  ;;  %v4622_v56 = vld [vmem:[#allocation22 + $0x18] sm:$0xf] }
 0x24f   : > { %5373 = vst [vmem:[#allocation120_spill] sm:$0xff] %v4620_v48  ;;  %5374 = vst [vmem:[#allocation121_spill] sm:$0xff] %v4622_v56  ;;  %v4624_v50 = vld [vmem:[#allocation22 + $0x1c] sm:$0xf]  ;;  %v4626_v58 = vld [vmem:[#allocation22 + $0x20] sm:$0xf] }
 0x250   : > { %5375 = vst [vmem:[#allocation122_spill] sm:$0xff] %v4624_v50  ;;  %5376 = vst [vmem:[#allocation123_spill] sm:$0xff] %v4626_v58  ;;  %v4628_v44 = vld [vmem:[#allocation22 + $0x24] sm:$0xf]  ;;  %v4630_v60 = vld [vmem:[#allocation22 + $0x28] sm:$0xf] }
 0x251   : > { %5377 = vst [vmem:[#allocation124_spill] sm:$0xff] %v4628_v44  ;;  %5378 = vst [vmem:[#allocation125_spill] sm:$0xff] %v4630_v60  ;;  %v4632_v46 = vld [vmem:[#allocation22 + $0x2c] sm:$0xf]  ;;  %v4634_v62 = vld [vmem:[#allocation22 + $0x30] sm:$0xf] }
 0x252   : > { %5379 = vst [vmem:[#allocation126_spill] sm:$0xff] %v4632_v46  ;;  %5380 = vst [vmem:[#allocation127_spill] sm:$0xff] %v4634_v62  ;;  %v4636_v40 = vld [vmem:[#allocation22 + $0x34] sm:$0xf]  ;;  %v4638_v52 = vld [vmem:[#allocation22 + $0x38] sm:$0xf] }
 0x253   : > { %5381 = vst [vmem:[#allocation128_spill] sm:$0xff] %v4636_v40  ;;  %5382 = vst [vmem:[#allocation129_spill] sm:$0xff] %v4638_v52  ;;  %v4640_v54 = vld [vmem:[#allocation22 + $0x3c] sm:$0xf]  ;;  %v4642_v48 = vld [vmem:[#allocation24] ss:$0 sm:$0xff] }
 0x254   : > { %5383 = vst [vmem:[#allocation130_spill] sm:$0xff] %v4640_v54  ;;  %5384 = vst [vmem:[#allocation131_spill] sm:$0xff] %v4642_v48  ;;  %v4644_v56 = vld [vmem:[#allocation25] sm:$0xf]  ;;  %v4646_v50 = vld [vmem:[#allocation25 + $0x4] sm:$0xf] }
 0x255   : > { %5385 = vst [vmem:[#allocation132_spill] sm:$0xff] %v4644_v56  ;;  %5386 = vst [vmem:[#allocation133_spill] sm:$0xff] %v4646_v50  ;;  %v4648_v58 = vld [vmem:[#allocation25 + $0x8] sm:$0xf]  ;;  %v4650_v44 = vld [vmem:[#allocation25 + $0xc] sm:$0xf] }
 0x256   : > { %5387 = vst [vmem:[#allocation134_spill] sm:$0xff] %v4648_v58  ;;  %5388 = vst [vmem:[#allocation135_spill] sm:$0xff] %v4650_v44  ;;  %v4652_v60 = vld [vmem:[#allocation25 + $0x10] sm:$0xf]  ;;  %v4654_v46 = vld [vmem:[#allocation25 + $0x14] sm:$0xf] }
 0x257   : > { %5389 = vst [vmem:[#allocation136_spill] sm:$0xff] %v4652_v60  ;;  %5390 = vst [vmem:[#allocation137_spill] sm:$0xff] %v4654_v46  ;;  %v4656_v62 = vld [vmem:[#allocation25 + $0x18] sm:$0xf]  ;;  %v4658_v40 = vld [vmem:[#allocation25 + $0x1c] sm:$0xf] }
 0x258   : > { %5391 = vst [vmem:[#allocation138_spill] sm:$0xff] %v4656_v62  ;;  %5392 = vst [vmem:[#allocation139_spill] sm:$0xff] %v4658_v40  ;;  %v4660_v52 = vld [vmem:[#allocation25 + $0x20] sm:$0xf]  ;;  %v4662_v54 = vld [vmem:[#allocation25 + $0x24] sm:$0xf] }
 0x259   : > { %5393 = vst [vmem:[#allocation140_spill] sm:$0xff] %v4660_v52  ;;  %5394 = vst [vmem:[#allocation141_spill] sm:$0xff] %v4662_v54  ;;  %v4664_v48 = vld [vmem:[#allocation25 + $0x28] sm:$0xf]  ;;  %v4666_v56 = vld [vmem:[#allocation25 + $0x2c] sm:$0xf] }
 0x25a   : > { %5395 = vst [vmem:[#allocation142_spill] sm:$0xff] %v4664_v48  ;;  %5396 = vst [vmem:[#allocation143_spill] sm:$0xff] %v4666_v56  ;;  %v4668_v50 = vld [vmem:[#allocation25 + $0x30] sm:$0xf]  ;;  %v4670_v58 = vld [vmem:[#allocation25 + $0x34] sm:$0xf] }
 0x25b   : > { %5397 = vst [vmem:[#allocation144_spill] sm:$0xff] %v4668_v50  ;;  %5398 = vst [vmem:[#allocation145_spill] sm:$0xff] %v4670_v58  ;;  %v4672_v44 = vld [vmem:[#allocation25 + $0x38] sm:$0xf]  ;;  %v4674_v60 = vld [vmem:[#allocation25 + $0x3c] sm:$0xf] }
 0x25c   : > { %5399 = vst [vmem:[#allocation146_spill] sm:$0xff] %v4672_v44  ;;  %5400 = vst [vmem:[#allocation147_spill] sm:$0xff] %v4674_v60  ;;  %v4676_v46 = vld [vmem:[#allocation27] ss:$0 sm:$0xff]  ;;  %v4678_v62 = vld [vmem:[#allocation28] sm:$0xf] }
 0x25d   : > { %5401 = vst [vmem:[#allocation148_spill] sm:$0xff] %v4676_v46  ;;  %5402 = vst [vmem:[#allocation149_spill] sm:$0xff] %v4678_v62  ;;  %v4680_v40 = vld [vmem:[#allocation28 + $0x4] sm:$0xf]  ;;  %v4682_v52 = vld [vmem:[#allocation28 + $0x8] sm:$0xf] }
 0x25e   : > { %5403 = vst [vmem:[#allocation150_spill] sm:$0xff] %v4680_v40  ;;  %5404 = vst [vmem:[#allocation151_spill] sm:$0xff] %v4682_v52  ;;  %v4684_v54 = vld [vmem:[#allocation28 + $0xc] sm:$0xf]  ;;  %v4686_v48 = vld [vmem:[#allocation28 + $0x10] sm:$0xf] }
 0x25f   : > { %5405 = vst [vmem:[#allocation152_spill] sm:$0xff] %v4684_v54  ;;  %5406 = vst [vmem:[#allocation153_spill] sm:$0xff] %v4686_v48  ;;  %v4688_v56 = vld [vmem:[#allocation28 + $0x14] sm:$0xf]  ;;  %v4690_v50 = vld [vmem:[#allocation28 + $0x18] sm:$0xf] }
 0x260   : > { %5407 = vst [vmem:[#allocation154_spill] sm:$0xff] %v4688_v56  ;;  %v4692_v58 = vld [vmem:[#allocation28 + $0x1c] sm:$0xf]  ;;  %v4694_v44 = vld [vmem:[#allocation28 + $0x20] sm:$0xf] }
 0x261   : > { %5408 = vst [vmem:[#allocation155_spill] sm:$0xff] %v4694_v44  ;;  %v4696_v60 = vld [vmem:[#allocation28 + $0x24] sm:$0xf]  ;;  %v4698_v46 = vld [vmem:[#allocation28 + $0x28] sm:$0xf] }
 0x262   : > { %5409 = vst [vmem:[#allocation156_spill] sm:$0xff] %v4698_v46  ;;  %v4700_v62 = vld [vmem:[#allocation28 + $0x2c] sm:$0xf]  ;;  %v4702_v40 = vld [vmem:[#allocation28 + $0x30] sm:$0xf] }
 0x263   : > { %5410 = vst [vmem:[#allocation157_spill] sm:$0xff] %v4700_v62  ;;  %5411 = vst [vmem:[#allocation158_spill] sm:$0xff] %v4702_v40  ;;  %v4704_v52 = vld [vmem:[#allocation28 + $0x34] sm:$0xf]  ;;  %v4706_v54 = vld [vmem:[#allocation28 + $0x38] sm:$0xf] }
 0x264   : > { %5412 = vst [vmem:[#allocation159_spill] sm:$0xff] %v4704_v52  ;;  %5413 = vst [vmem:[#allocation160_spill] sm:$0xff] %v4706_v54  ;;  %v4708_v48 = vld [vmem:[#allocation28 + $0x3c] sm:$0xf]  ;;  %v4710_v56 = vld [vmem:[#allocation30] ss:$0 sm:$0xff] }
 0x265   : > { %5414 = vst [vmem:[#allocation161_spill] sm:$0xff] %v4708_v48  ;;  %5415 = vst [vmem:[#allocation162_spill] sm:$0xff] %v4710_v56  ;;  %v4715_v44 = vld [vmem:[%s5416_s1] sm:$0xf]  ;;  %v4720_v46 = vld [vmem:[%s5416_s1 + $0x4] sm:$0xf] }
 0x266   : > { %5417 = vst [vmem:[#allocation163_spill] sm:$0xff] %v4715_v44  ;;  %5418 = vst [vmem:[#allocation164_spill] sm:$0xff] %v4720_v46  ;;  %v4725_v40 = vld [vmem:[%s5416_s1 + $0x8] sm:$0xf]  ;;  %v4730_v56 = vld [vmem:[%s5416_s1 + $0xc] sm:$0xf] }
 0x267   : > { %5419 = vst [vmem:[#allocation165_spill] sm:$0xff] %v4725_v40  ;;  %5420 = vst [vmem:[#allocation166_spill] sm:$0xff] %v4730_v56  ;;  %v4735_v44 = vld [vmem:[%s5416_s1 + $0x10] sm:$0xf]  ;;  %v4740_v46 = vld [vmem:[%s5416_s1 + $0x14] sm:$0xf] }
 0x268   : > { %5421 = vst [vmem:[#allocation167_spill] sm:$0xff] %v4735_v44  ;;  %5422 = vst [vmem:[#allocation168_spill] sm:$0xff] %v4740_v46  ;;  %v4745_v40 = vld [vmem:[%s5416_s1 + $0x18] sm:$0xf]  ;;  %v4750_v56 = vld [vmem:[%s5416_s1 + $0x1c] sm:$0xf] }
 0x269   : > { %5423 = vst [vmem:[#allocation169_spill] sm:$0xff] %v4745_v40  ;;  %5424 = vst [vmem:[#allocation170_spill] sm:$0xff] %v4750_v56  ;;  %v4755_v54 = vld [vmem:[%s5416_s1 + $0x20] sm:$0xf]  ;;  %v4760_v44 = vld [vmem:[%s5416_s1 + $0x24] sm:$0xf] }
 0x26a   : > { %5425 = vst [vmem:[#allocation171_spill] sm:$0xff] %v4755_v54  ;;  %5426 = vst [vmem:[#allocation172_spill] sm:$0xff] %v4760_v44  ;;  %v4765_v46 = vld [vmem:[%s5416_s1 + $0x28] sm:$0xf]  ;;  %v4770_v40 = vld [vmem:[%s5416_s1 + $0x2c] sm:$0xf] }
 0x26b   : > { %5427 = vst [vmem:[#allocation173_spill] sm:$0xff] %v4765_v46  ;;  %5428 = vst [vmem:[#allocation174_spill] sm:$0xff] %v4770_v40  ;;  %v4775_v56 = vld [vmem:[%s5416_s1 + $0x30] sm:$0xf]  ;;  %v4780_v54 = vld [vmem:[%s5416_s1 + $0x34] sm:$0xf] }
 0x26c   : > { %5429 = vst [vmem:[#allocation175_spill] sm:$0xff] %v4775_v56  ;;  %5430 = vst [vmem:[#allocation176_spill] sm:$0xff] %v4780_v54  ;;  %v4785_v44 = vld [vmem:[%s5416_s1 + $0x38] sm:$0xf]  ;;  %v4790_v46 = vld [vmem:[%s5416_s1 + $0x3c] sm:$0xf] }
 0x26d   : > { %5431 = vst [vmem:[#allocation177_spill] sm:$0xff] %v4785_v44  ;;  %5432 = vst [vmem:[#allocation178_spill] sm:$0xff] %v4790_v46  ;;  %v4795_v40 = vld [vmem:[%s5433_s29] ss:$0 sm:$0xff]  ;;  %1119 = sbr.rel (%p2530_p11) target bundleno = 628 (0x274), region = 172  ;;  %v1122_v54 = vld [vmem:[#allocation9] sm:$0xff] (!%p2530_p11) }
 0x26e   : > { %5434 = vst [vmem:[#allocation179_spill] sm:$0xff] %v4795_v40  ;;  %v4800_v56 = vld [vmem:[%s5435_s3] ss:$0 sm:$0xff]  ;;  %1123 = vst [vmem:[#allocation3] sm:$0xff] (!%p2530_p11), %v1122_v54 }
 0x26f   : > { %v1120_v44 = vld [vmem:[#allocation7] sm:$0xff] (!%p2530_p11) }
 0x270   : > { %1121 = vst [vmem:[#allocation2] sm:$0xff] (!%p2530_p11), %v1120_v44 }
 0x274 PF: > { %v2532_v46 = vcombine.high %v4378_v0, %v4382_v2  ;;  %v2531_v40 = vcombine.low %v4378_v0, %v4382_v2  ;;  %v2535_v48 = vcombine.high %v4386_v4, %v4390_v6  ;;  %v2534_v52 = vcombine.low %v4386_v4, %v4390_v6  ;;  %s5438_s8 = scalar_lea.vmem [#allocation4], %s4338_s0  ;;  %s5564_s7 = sld [smem:[#allocation48_spill]] }
 0x275   : > { %v2538_v44 = vcombine.high %v4394_v8, %v4398_v10  ;;  %v2537_v62 = vcombine.low %v4394_v8, %v4398_v10  ;;  %v2541_v0 = vcombine.high %v4402_v12, %v4406_v14  ;;  %v2533_v4 = vcombine.low %v4380_v1, %v4384_v3  ;;  %s5566_s22 = sld [smem:[#allocation194_spill]]  ;;  %s2219_s4 = sshll.u32 %s929_s9, 4  ;;  %s2220_s4 = int_to_ptr.vmem [resolvable:$true] %s2219_s4 }
 0x276   : > { %1401 = vmatprep.subr.bf16.mxu0 %v2532_v46  ;;  %v2560_v6 = vcombine.low %v4452_v37, %v4456_v39  ;;  %v2540_v8 = vcombine.low %v4402_v12, %v4406_v14  ;;  %v2536_v10 = vcombine.low %v4388_v5, %v4392_v7  ;;  %v2563_v1 = vcombine.low %v4460_v41, %v4464_v43  ;;  %v5439_v37 = vld [vmem:[#allocation65_spill] sm:$0xff]  ;;  %v5440_v39 = vld [vmem:[#allocation64_spill] sm:$0xff]  ;;  %v5443_v46 = vld [vmem:[#allocation67_spill] sm:$0xff]  ;;  %s2191_s3 = scalar_lea.sflag [#allocation33], %s4335_s2  ;;  %s3600_s24 = scalar_lea.vmem %s2220_s4, 128 }
 0x277   : > { %1402 = vmatpush1.bf16.msra.mxu0 %v2531_v40  ;;  %v1125_v54 = vld [vmem:[#allocation2] sm:$0xff]  ;;  %v2557_v40 = vcombine.low %v4444_v33, %v4448_v35  ;;  %v2544_v33 = vcombine.high %v4410_v16, %v4414_v18  ;;  %v2543_v3 = vcombine.low %v4410_v16, %v4414_v18  ;;  %v2539_v12 = vcombine.low %v4396_v9, %v4400_v11  ;;  %p3601_p0 = scmp.ne.s32.totalorder %s2220_s4, %s3600_s24  ;;  %p5567_p4 = scmp.ne.s32.totalorder %s5296_s25, 0 }
 0x278   : > { %1403 = vmatprep.subr.bf16.mxu0 %v2535_v48  ;;  %v1128_v2 = vpack.c.bf16 %v1125_v54, %v1125_v54  ;;  %v2547_v5 = vcombine.high %v4418_v20, %v4422_v22  ;;  %v2566_v7 = vcombine.low %v4468_v45, %v4472_v47  ;;  %v2546_v14 = vcombine.low %v4418_v20, %v4422_v22  ;;  %v5445_v48 = vld [vmem:[#allocation56_spill] sm:$0xff]  ;;  %v5452_v54 = vld [vmem:[#allocation70_spill] sm:$0xff] }
 0x279   : > { %2651 = vmatprep.subr.bf16.mxu1 %v2557_v40  ;;  %v2542_v16 = vcombine.low %v4404_v13, %v4408_v15  ;;  %v2550_v9 = vcombine.high %v4426_v24, %v4430_v26  ;;  %v2569_v11 = vcombine.low %v4476_v49, %v4480_v51  ;;  %v2549_v18 = vcombine.low %v4426_v24, %v4430_v26  ;;  %v5446_v49 = vld [vmem:[#allocation55_spill] sm:$0xff]  ;;  %p3602_p6 = pnand %p3601_p0, %p5567_p4 }
 0x27a   : > { %1433 = vmatprep.mubr.bf16.mxu0 %v1128_v2  ;;  %2652 = vmatpush3.bf16.msra.mxu1 %v2533_v4  ;;  %v2545_v20 = vcombine.low %v4412_v17, %v4416_v19  ;;  %v2553_v13 = vcombine.high %v4434_v28, %v4438_v30  ;;  %v2572_v15 = vcombine.low %v4484_v53, %v4488_v55  ;;  %v5447_v53 = vld [vmem:[#allocation69_spill] sm:$0xff]  ;;  %v5448_v55 = vld [vmem:[#allocation68_spill] sm:$0xff]  ;;  %v5454_v40 = vld [vmem:[#allocation59_spill] sm:$0xff]  ;;  %vm3770_vm0 = vmmov 0   ;;  %s5248_s26 = sshll.u32 %s5564_s7, 7 }
 0x27b   : > { %1404 = vmatpush1.bf16.msra.mxu0 %v2534_v52  ;;  %2653 = vmatprep.subr.bf16.mxu1 %v2560_v6  ;;  %v2552_v22 = vcombine.low %v4434_v28, %v4438_v30  ;;  %v2548_v24 = vcombine.low %v4420_v21, %v4424_v23  ;;  %v2556_v17 = vcombine.high %v4442_v32, %v4446_v34  ;;  %s5110_s29 = scalar_lea.hbm %s5566_s22, %s5248_s26  ;;  %p3603_p10 = pneg %p3602_p6 }
 0x27c   : > { %1405 = vmatprep.subr.bf16.mxu0 %v2538_v44  ;;  %1474 = vmatprep.mubr.bf16.mxu1 %v1128_v2  ;;  %v2575_v19 = vcombine.low %v4492_v57, %v4496_v59  ;;  %v2555_v26 = vcombine.low %v4442_v32, %v4446_v34  ;;  %v2551_v28 = vcombine.low %v4428_v25, %v4432_v27  ;;  %v5437_v34 = vld [vmem:[#allocation52_spill] sm:$0xff]  ;;  %v1124_v27 = vld [vmem:[%s5438_s8] sm:$0xff]  ;;  %s3771_s8 = smov [#allocation32]  }
 0x27d   : > { %v2559_v21 = vcombine.high %v4450_v36, %v4454_v38  ;;  %v2578_v23 = vcombine.low %v4500_v61, %v4504_v63  ;;  %v2558_v30 = vcombine.low %v4450_v36, %v4454_v38  ;;  %v2554_v32 = vcombine.low %v4436_v29, %v4440_v31  ;;  %v5441_v36 = vld [vmem:[#allocation54_spill] sm:$0xff]  ;;  %v5442_v38 = vld [vmem:[#allocation53_spill] sm:$0xff]  ;;  %v5451_v44 = vld [vmem:[#allocation71_spill] sm:$0xff]  ;;  %s3604_s6 = sshll.u32 %s3771_s8, 4  ;;  %s3605_s6 = int_to_ptr.vmem [resolvable:$false] %s3604_s6 }
 0x27e   : > { %2654 = vmatpush3.bf16.msra.mxu1 %v2536_v10  ;;  %v2562_v25 = vcombine.high %v5437_v34, %v4462_v42  ;;  %v2561_v35 = vcombine.low %v5437_v34, %v4462_v42  ;;  %v2580_v41 = vcombine.low %v5440_v39, %v5439_v37  ;;  %v2565_v43 = vcombine.high %v5442_v38, %v5441_v36  ;;  %v5444_v42 = vld [vmem:[#allocation66_spill] sm:$0xff]  ;;  %v5450_v61 = vld [vmem:[#allocation57_spill] sm:$0xff]  ;;  %v5453_v2 = vld [vmem:[#allocation60_spill] sm:$0xff]  ;;  %s3606_s1 = scalar_lea.vmem %s3605_s6, 256  ;;  %p3607_p13 = scmp.lt.s32.totalorder %s2220_s4, %s3605_s6 }
 0x27f   : > { %1406 = vmatpush1.bf16.msra.mxu0 %v2537_v62  ;;  %2655 = vmatprep.subr.bf16.mxu1 %v2563_v1  ;;  %v1127_v29 = vpack.c.bf16 %v1124_v27, %v1124_v27  ;;  %v3769_v31 = vmov 0.0   ;;  %v2564_v45 = vcombine.low %v5442_v38, %v5441_v36  ;;  %v2581_v47 = vcombine.low %v5444_v42, %v5443_v46  ;;  %v5449_v59 = vld [vmem:[#allocation58_spill] sm:$0xff]  ;;  %v5456_v10 = vld [vmem:[#allocation72_spill] sm:$0xff]  ;;  %v5472_v34 = vld [vmem:[#allocation87_spill] sm:$0xff]  ;;  %p3608_p2 = scmp.lt.s32.totalorder %s3606_s1, %s3600_s24 }
 0x280   : > { %1407 = vmatprep.subr.bf16.mxu0 %v2541_v0  ;;  %v2568_v51 = vcombine.high %v5446_v49, %v5445_v48  ;;  %v2567_v52 = vcombine.low %v5446_v49, %v5445_v48  ;;  %v2582_v57 = vcombine.low %v5448_v55, %v5447_v53  ;;  %v2571_v62 = vcombine.high %v5450_v61, %v5449_v59  ;;  %v5457_v1 = vld [vmem:[#allocation62_spill] sm:$0xff]  ;;  %v5475_v39 = vld [vmem:[#allocation92_spill] sm:$0xff]  ;;  %v5479_v48 = vld [vmem:[#allocation63_spill] sm:$0xff] }
 0x281   : > { %v2570_v63 = vcombine.low %v5450_v61, %v5449_v59  ;;  %v2583_v0 = vcombine.low %v5452_v54, %v5451_v44  ;;  %v2574_v4 = vcombine.high %v5454_v40, %v5453_v2  ;;  %v2573_v6 = vcombine.low %v5454_v40, %v5453_v2  ;;  %v5473_v27 = vld [vmem:[#allocation90_spill] sm:$0xff]  ;;  %v5480_v40 = vld [vmem:[#allocation99_spill] sm:$0xff]  ;;  %p3609_p7 = por %p3608_p2, %p3607_p13 }
 0x282   : > { %2656 = vmatpush3.bf16.msra.mxu1 %v2539_v12  ;;  %v5477_v38 = vld [vmem:[#allocation94_spill] sm:$0xff] }
 0x283   : > { %1408 = vmatpush1.bf16.msra.mxu0 %v2540_v8  ;;  %2657 = vmatprep.subr.bf16.mxu1 %v2566_v7  ;;  %v5455_v8 = vld [vmem:[#allocation73_spill] sm:$0xff]  ;;  %v5459_v7 = vld [vmem:[#allocation75_spill] sm:$0xff]  ;;  %p3610_p8 = pnand %p3609_p7, %p3603_p10 }
 0x284   : > { %1409 = vmatprep.subr.bf16.mxu0 %v2544_v33  ;;  %v2584_v33 = vcombine.low %v5456_v10, %v5455_v8  ;;  %v5482_v10 = vld [vmem:[#allocation101_spill] sm:$0xff] }
 0x286   : > { %2658 = vmatpush3.bf16.msra.mxu1 %v2542_v16 }
 0x287   : > { %1410 = vmatpush1.bf16.msra.mxu0 %v2543_v3  ;;  %2659 = vmatprep.subr.bf16.mxu1 %v2569_v11  ;;  %v5458_v3 = vld [vmem:[#allocation61_spill] sm:$0xff]  ;;  %v5462_v11 = vld [vmem:[#allocation76_spill] sm:$0xff] }
 0x288   : > { %1411 = vmatprep.subr.bf16.mxu0 %v2547_v5  ;;  %v2577_v12 = vcombine.high %v5458_v3, %v5457_v1  ;;  %v2576_v5 = vcombine.low %v5458_v3, %v5457_v1  ;;  %v5484_v3 = vld [vmem:[#allocation103_spill] sm:$0xff] }
 0x28a   : > { %2660 = vmatpush3.bf16.msra.mxu1 %v2545_v20  ;;  %v5463_v20 = vld [vmem:[#allocation79_spill] sm:$0xff] }
 0x28b   : > { %1412 = vmatpush1.bf16.msra.mxu0 %v2546_v14  ;;  %2661 = vmatprep.subr.bf16.mxu1 %v2572_v15  ;;  %v5460_v14 = vld [vmem:[#allocation74_spill] sm:$0xff] }
 0x28c   : > { %1413 = vmatprep.subr.bf16.mxu0 %v2550_v9  ;;  %v2585_v16 = vcombine.low %v5460_v14, %v5459_v7  ;;  %v5461_v9 = vld [vmem:[#allocation77_spill] sm:$0xff]  ;;  %v5487_v14 = vld [vmem:[#allocation104_spill] sm:$0xff] }
 0x28d   : > { %v5486_v7 = vld [vmem:[#allocation105_spill] sm:$0xff] }
 0x28e   : > { %2662 = vmatpush3.bf16.msra.mxu1 %v2548_v24  ;;  %v5466_v24 = vld [vmem:[#allocation81_spill] sm:$0xff] }
 0x28f   : > { %1414 = vmatpush1.bf16.msra.mxu0 %v2549_v18  ;;  %2663 = vmatprep.subr.bf16.mxu1 %v2575_v19  ;;  %v2586_v18 = vcombine.low %v5462_v11, %v5461_v9  ;;  %v5467_v19 = vld [vmem:[#allocation84_spill] sm:$0xff]  ;;  %v5488_v9 = vld [vmem:[#allocation107_spill] sm:$0xff]  ;;  %v5489_v11 = vld [vmem:[#allocation106_spill] sm:$0xff] }
 0x290   : > { %1415 = vmatprep.subr.bf16.mxu0 %v2553_v13  ;;  %v5464_v13 = vld [vmem:[#allocation78_spill] sm:$0xff] }
 0x291   : > { %v2587_v15 = vcombine.low %v5464_v13, %v5463_v20  ;;  %v5490_v13 = vld [vmem:[#allocation109_spill] sm:$0xff] }
 0x292   : > { %2664 = vmatpush3.bf16.msra.mxu1 %v2551_v28 }
 0x293   : > { %1416 = vmatpush1.bf16.msra.mxu0 %v2552_v22  ;;  %2665 = vmatprep.subr.bf16.mxu1 %v2578_v23  ;;  %v5465_v22 = vld [vmem:[#allocation82_spill] sm:$0xff]  ;;  %v5470_v23 = vld [vmem:[#allocation85_spill] sm:$0xff] }
 0x294   : > { %1417 = vmatprep.subr.bf16.mxu0 %v2556_v17  ;;  %v2589_v17 = vcombine.low %v5466_v24, %v5465_v22 }
 0x296   : > { %2666 = vmatpush3.bf16.msra.mxu1 %v2554_v32  ;;  %v5471_v32 = vld [vmem:[#allocation88_spill] sm:$0xff] }
 0x297   : > { %1418 = vmatpush1.bf16.msra.mxu0 %v2555_v26  ;;  %2736 = vmatprep.subr.bf16.mxu1 %v3769_v31  ;;  %v5468_v26 = vld [vmem:[#allocation83_spill] sm:$0xff] }
 0x298   : > { %1419 = vmatprep.subr.bf16.mxu0 %v2559_v21  ;;  %v2590_v28 = vcombine.low %v5468_v26, %v5467_v19  ;;  %v5469_v21 = vld [vmem:[#allocation86_spill] sm:$0xff] }
 0x299   : > { %1475 = vmatmul.mubr.bf16.vlgmr.msra.gmra.mrb[0].mxu1 %v1127_v29  ;;  %v5493_v19 = vld [vmem:[#allocation110_spill] sm:$0xff] }
 0x29a   : > { %2737 = vmatpush3.bf16.msra.mxu1 %v2580_v41  ;;  %2752 = vmatprep.mubr.msk.bf16.mxu1 %vm3770_vm0, %v3769_v31  ;;  %v5476_v41 = vld [vmem:[#allocation91_spill] sm:$0xff] }
 0x29b   : > { %1420 = vmatpush1.bf16.msra.mxu0 %v2558_v30  ;;  %2738 = vmatprep.subr.bf16.mxu1 %v3769_v31  ;;  %v2591_v30 = vcombine.low %v5470_v23, %v5469_v21  ;;  %v2594_v36 = vcombine.low %v5476_v41, %v5475_v39  ;;  %v5494_v21 = vld [vmem:[#allocation113_spill] sm:$0xff]  ;;  %v5495_v23 = vld [vmem:[#allocation112_spill] sm:$0xff]  ;;  %v5499_v39 = vld [vmem:[#allocation134_spill] sm:$0xff] }
 0x29c   : > { %1421 = vmatprep.subr.bf16.mxu0 %v2562_v25  ;;  %v2592_v25 = vcombine.low %v5472_v34, %v5471_v32  ;;  %v5496_v34 = vld [vmem:[#allocation133_spill] sm:$0xff] }
 0x29e   : > { %2739 = vmatpush3.bf16.msra.mxu1 %v2581_v47 }
 0x29f   : > { %1422 = vmatpush1.bf16.msra.mxu0 %v2561_v35  ;;  %2740 = vmatprep.subr.bf16.mxu1 %v3769_v31  ;;  %v5474_v35 = vld [vmem:[#allocation89_spill] sm:$0xff] }
 0x2a0   : > { %1423 = vmatprep.subr.bf16.mxu0 %v2565_v43  ;;  %v2593_v37 = vcombine.low %v5474_v35, %v5473_v27  ;;  %v5478_v43 = vld [vmem:[#allocation93_spill] sm:$0xff] }
 0x2a2   : > { %2741 = vmatpush3.bf16.msra.mxu1 %v2582_v57 }
 0x2a3   : > { %1424 = vmatpush1.bf16.msra.mxu0 %v2564_v45  ;;  %2742 = vmatprep.subr.bf16.mxu1 %v3769_v31  ;;  %v1130_v45 = vlaneseq }
 0x2a4   : > { %1425 = vmatprep.subr.bf16.mxu0 %v2568_v51 }
 0x2a5   : > { %v1131_v46 = vshrl.u32 %v1130_v45, 7  ;;  %v5503_v45 = vld [vmem:[#allocation138_spill] sm:$0xff] }
 0x2a6   : > { %2743 = vmatpush3.bf16.msra.mxu1 %v2583_v0 }
 0x2a7   : > { %1426 = vmatpush1.bf16.msra.mxu0 %v2567_v52  ;;  %2744 = vmatprep.subr.bf16.mxu1 %v3769_v31  ;;  %v1140_v42 = vsub.s32 2, %v1131_v46  ;;  %v1132_v59 = vsub.s32 0, %v1131_v46  ;;  %v1136_v20 = vsub.s32 1, %v1131_v46 }
 0x2a8   : > { %1427 = vmatprep.subr.bf16.mxu0 %v2571_v62 }
 0x2a9   : > { %v1141_v49 = vrot.slane %v5479_v48, %v1140_v42  ;;  %v1133_v61 = vrot.slane %v5479_v48, %v1132_v59  ;;  %v1137_v24 = vrot.slane %v5479_v48, %v1136_v20  ;;  %v5504_v42 = vld [vmem:[#allocation141_spill] sm:$0xff]  ;;  %v5520_v20 = vld [vmem:[#allocation119_spill] sm:$0xff] }
 0x2aa   : > { %2745 = vmatpush3.bf16.msra.mxu1 %v2584_v33  ;;  %v5483_v33 = vld [vmem:[#allocation100_spill] sm:$0xff] }
 0x2ab   : > { %1428 = vmatpush1.bf16.msra.mxu0 %v2570_v63  ;;  %2746 = vmatprep.subr.bf16.mxu1 %v3769_v31  ;;  %v2600_v1 = vcombine.low %v5483_v33, %v5482_v10 }
 0x2ac   : > { %1429 = vmatprep.subr.bf16.mxu0 %v2574_v4  ;;  %v5481_v4 = vld [vmem:[#allocation98_spill] sm:$0xff] }
 0x2ae   : > { %2747 = vmatpush3.bf16.msra.mxu1 %v2585_v16  ;;  %v2602_v16 = vcombine.low %v5487_v14, %v5486_v7  ;;  %v5516_v7 = vld [vmem:[#allocation115_spill] sm:$0xff] }
 0x2af   : > { %1430 = vmatpush1.bf16.msra.mxu0 %v2573_v6  ;;  %2748 = vmatprep.subr.bf16.mxu1 %v3769_v31  ;;  %v2599_v6 = vcombine.low %v5481_v4, %v5480_v40 }
 0x2b0   : > { %1431 = vmatprep.subr.bf16.mxu0 %v2577_v12  ;;  %v5485_v12 = vld [vmem:[#allocation102_spill] sm:$0xff] }
 0x2b2   : > { %2749 = vmatpush3.bf16.msra.mxu1 %v2586_v18  ;;  %v2603_v18 = vcombine.low %v5489_v11, %v5488_v9  ;;  %v5517_v9 = vld [vmem:[#allocation118_spill] sm:$0xff]  ;;  %v5518_v11 = vld [vmem:[#allocation117_spill] sm:$0xff] }
 0x2b3   : > { %1432 = vmatpush1.bf16.msra.mxu0 %v2576_v5  ;;  %2750 = vmatprep.subr.bf16.mxu1 %v3769_v31  ;;  %v2601_v5 = vcombine.low %v5485_v12, %v5484_v3 }
 0x2b4   : > { %2756 = vmatprep.subr.bf16.mxu0 %v3769_v31 }
 0x2b6   : > { %1434 = vmatmul.mubr.bf16.vlgmr.msra.gmra.mrb[0].mxu0 %v1127_v29  ;;  %2751 = vmatpush3.bf16.msra.mxu1 %v2587_v15  ;;  %v2595_v29 = vcombine.low %v5478_v43, %v5477_v38  ;;  %v5491_v15 = vld [vmem:[#allocation108_spill] sm:$0xff] }
 0x2b7   : > { %2776 = vmatprep.subr.bf16.mxu1 %v3769_v31  ;;  %2772 = vmatprep.mubr.msk.bf16.mxu0 %vm3770_vm0, %v3769_v31  ;;  %v2604_v22 = vcombine.low %v5491_v15, %v5490_v13  ;;  %v5501_v38 = vld [vmem:[#allocation136_spill] sm:$0xff]  ;;  %v5521_v15 = vld [vmem:[#allocation122_spill] sm:$0xff] }
 0x2b8   : > { %2757 = vmatpush3.bf16.msra.mxu0 %v2589_v17  ;;  %v5492_v17 = vld [vmem:[#allocation111_spill] sm:$0xff] }
 0x2b9   : > { %2758 = vmatprep.subr.bf16.mxu0 %v3769_v31  ;;  %v2605_v26 = vcombine.low %v5493_v19, %v5492_v17  ;;  %v5523_v17 = vld [vmem:[#allocation124_spill] sm:$0xff]  ;;  %v5524_v19 = vld [vmem:[#allocation123_spill] sm:$0xff] }
 0x2bc   : > { %2759 = vmatpush3.bf16.msra.mxu0 %v2590_v28 }
 0x2bd   : > { %2760 = vmatprep.subr.bf16.mxu0 %v3769_v31 }
 0x2c0   : > { %2761 = vmatpush3.bf16.msra.mxu0 %v2591_v30  ;;  %v2606_v30 = vcombine.low %v5495_v23, %v5494_v21  ;;  %v5526_v21 = vld [vmem:[#allocation125_spill] sm:$0xff] }
 0x2c1   : > { %2762 = vmatprep.subr.bf16.mxu0 %v3769_v31 }
 0x2c4   : > { %2763 = vmatpush3.bf16.msra.mxu0 %v2592_v25  ;;  %v5497_v25 = vld [vmem:[#allocation132_spill] sm:$0xff] }
 0x2c5   : > { %2764 = vmatprep.subr.bf16.mxu0 %v3769_v31  ;;  %v2617_v27 = vcombine.low %v5497_v25, %v5496_v34 }
 0x2c8   : > { %2765 = vmatpush3.bf16.msra.mxu0 %v2593_v37  ;;  %v5498_v37 = vld [vmem:[#allocation135_spill] sm:$0xff] }
 0x2c9   : > { %2766 = vmatprep.subr.bf16.mxu0 %v3769_v31  ;;  %v2618_v41 = vcombine.low %v5499_v39, %v5498_v37  ;;  %v5531_v39 = vld [vmem:[#allocation114_spill] sm:$0xff] }
 0x2cc   : > { %2767 = vmatpush3.bf16.msra.mxu0 %v2594_v36  ;;  %v5500_v36 = vld [vmem:[#allocation137_spill] sm:$0xff] }
 0x2cd   : > { %2768 = vmatprep.subr.bf16.mxu0 %v3769_v31  ;;  %v2619_v43 = vcombine.low %v5501_v38, %v5500_v36 }
 0x2d0   : > { %2769 = vmatpush3.bf16.msra.mxu0 %v2595_v29  ;;  %v5502_v29 = vld [vmem:[#allocation139_spill] sm:$0xff] }
 0x2d1   : > { %2770 = vmatprep.subr.bf16.mxu0 %v3769_v31  ;;  %v2620_v46 = vcombine.low %v5503_v45, %v5502_v29  ;;  %v5532_v45 = vld [vmem:[#allocation150_spill] sm:$0xff] }
 0x36c   : > { %v2667_v47 = vpop.f32.mrb[0].mxu1 }
 0x36d   : > { %v2668_v51 = vpop.f32.mrb[1].mxu1 }
 0x36e   : > { %v2669_v52 = vadd.f32 %v2668_v51, %v2667_v47  ;;  %v2670_v53 = vpop.f32.mrb[2].mxu1  ;;  %v5505_v47 = vld [vmem:[#allocation140_spill] sm:$0xff]  ;;  %v5507_v51 = vld [vmem:[#allocation142_spill] sm:$0xff] }
 0x36f   : > { %v2671_v55 = vpop.f32.mrb[3].mxu1  ;;  %v2621_v48 = vcombine.low %v5505_v47, %v5504_v42  ;;  %v5508_v53 = vld [vmem:[#allocation145_spill] sm:$0xff] }
 0x370   : > { %v4955_v57 = vadd.f32 %v2669_v52, %v1141_v49  ;;  %v5506_v49 = vld [vmem:[#allocation143_spill] sm:$0xff]  ;;  %v5509_v55 = vld [vmem:[#allocation144_spill] sm:$0xff] }
 0x371   : > { %v2622_v52 = vcombine.low %v5507_v51, %v5506_v49  ;;  %v2623_v59 = vcombine.low %v5509_v55, %v5508_v53  ;;  %v5535_v49 = vld [vmem:[#allocation151_spill] sm:$0xff]  ;;  %v5537_v53 = vld [vmem:[#allocation153_spill] sm:$0xff] }
 0x389   : > { %v1435_v62 = vpop.f32.mrb[0].mxu0 }
 0x38a   : > { %v1436_v63 = vadd.f32 %v1435_v62, %v1133_v61  ;;  %v1437_v44 = vpop.f32.mrb[1].mxu0  ;;  %v1484_v61 = vmax.f32 %v4955_v57, 0.0  ;;  %v5510_v62 = vld [vmem:[#allocation147_spill] sm:$0xff]  ;;  %v5017_v57 = vld [vmem:[#allocation3] sm:$0xff] }
 0x38b   : > { %v1439_v54 = vpop.f32.mrb[2].mxu0  ;;  %v1438_v28 = vadd.f32 %v1437_v44, %v1137_v24  ;;  %v2174_v4 = vmul.f32 %v4800_v56, %v5017_v57  ;;  %v5519_v56 = vld [vmem:[#allocation120_spill] sm:$0xff] }
 0x38c   : > { %v1482_v0 = vmax.f32 %v1436_v63, 0.0  ;;  %v1440_v2 = vpop.f32.mrb[3].mxu0  ;;  %v5511_v63 = vld [vmem:[#allocation146_spill] sm:$0xff]  ;;  %v1874_v54 = vpack.c.bf16 %v1484_v61, %v1484_v61  ;;  %v2610_v13 = vcombine.low %v5520_v20, %v5519_v56  ;;  %v5538_v61 = vld [vmem:[#allocation155_spill] sm:$0xff] }
 0x38d   : > { %v1483_v32 = vmax.f32 %v1438_v28, 0.0  ;;  %v2624_v44 = vcombine.low %v5511_v63, %v5510_v62  ;;  %v5513_v2 = vld [vmem:[#allocation95_spill] sm:$0xff]  ;;  %2175 = vadd.xlane.f32.xlu0 %v2174_v4  ;;  %v5525_v28 = vld [vmem:[#allocation126_spill] sm:$0xff]  ;;  %v2630_v62 = vcombine.low %v5538_v61, %v4696_v60  ;;  %v5539_v63 = vld [vmem:[#allocation157_spill] sm:$0xff] }
 0x38e   : > { %v1485_v8 = vpack.c.bf16 %v1482_v0, %v1482_v0  ;;  %v5512_v0 = vld [vmem:[#allocation96_spill] sm:$0xff]  ;;  %v2613_v23 = vcombine.low %v5526_v21, %v5525_v28  ;;  %v5551_v56 = vld [vmem:[#allocation167_spill] sm:$0xff]  ;;  %v5557_v28 = vld [vmem:[#allocation173_spill] sm:$0xff] }
 0x38f   : > { %v1682_v35 = vpack.c.bf16 %v1483_v32, %v1483_v32  ;;  %v2596_v40 = vcombine.low %v5513_v2, %v5512_v0  ;;  %v5528_v32 = vld [vmem:[#allocation127_spill] sm:$0xff]  ;;  %v5542_v2 = vld [vmem:[#allocation158_spill] sm:$0xff]  ;;  %v5544_v4 = vld [vmem:[#allocation160_spill] sm:$0xff] }
 0x390   : > { %2753 = vmatmul.mubr.bf16.vlgmr.msra.gmra.mrb[4].mxu1 %v1485_v8  ;;  %v5514_v8 = vld [vmem:[#allocation80_spill] sm:$0xff]  ;;  %v5541_v0 = vld [vmem:[#allocation159_spill] sm:$0xff] }
 0x391   : > { %2777 = vmatpush3.bf16.msra.mxu1 %v2599_v6  ;;  %2792 = vmatprep.mubr.msk.bf16.mxu1 %vm3770_vm0, %v3769_v31  ;;  %v5545_v60 = vld [vmem:[#allocation148_spill] sm:$0xff] }
 0x392   : > { %2778 = vmatprep.subr.bf16.mxu1 %v3769_v31  ;;  %2771 = vmatpush3.bf16.msra.mxu0 %v2596_v40  ;;  %v2632_v40 = vcombine.low %v5542_v2, %v5541_v0 }
 0x393   : > { %2796 = vmatprep.subr.bf16.mxu0 %v3769_v31 }
 0x395   : > { %2779 = vmatpush3.bf16.msra.mxu1 %v2600_v1 }
 0x396   : > { %2780 = vmatprep.subr.bf16.mxu1 %v3769_v31 }
 0x399   : > { %2781 = vmatpush3.bf16.msra.mxu1 %v2601_v5  ;;  %v5515_v5 = vld [vmem:[#allocation116_spill] sm:$0xff] }
 0x39a   : > { %2782 = vmatprep.subr.bf16.mxu1 %v3769_v31  ;;  %v2608_v14 = vcombine.low %v5516_v7, %v5515_v5  ;;  %v5546_v5 = vld [vmem:[#allocation164_spill] sm:$0xff]  ;;  %v5547_v7 = vld [vmem:[#allocation163_spill] sm:$0xff] }
 0x39d   : > { %2783 = vmatpush3.bf16.msra.mxu1 %v2602_v16 }
 0x39e   : > { %2784 = vmatprep.subr.bf16.mxu1 %v3769_v31 }
 0x3a1   : > { %2785 = vmatpush3.bf16.msra.mxu1 %v2603_v18  ;;  %v2609_v18 = vcombine.low %v5518_v11, %v5517_v9  ;;  %v5549_v9 = vld [vmem:[#allocation165_spill] sm:$0xff] }
 0x3a2   : > { %2786 = vmatprep.subr.bf16.mxu1 %v3769_v31 }
 0x3a5   : > { %2787 = vmatpush3.bf16.msra.mxu1 %v2604_v22  ;;  %v5522_v22 = vld [vmem:[#allocation121_spill] sm:$0xff] }
 0x3a6   : > { %2788 = vmatprep.subr.bf16.mxu1 %v3769_v31  ;;  %v2611_v24 = vcombine.low %v5522_v22, %v5521_v15  ;;  %v5553_v15 = vld [vmem:[#allocation169_spill] sm:$0xff] }
 0x3a9   : > { %2789 = vmatpush3.bf16.msra.mxu1 %v2605_v26  ;;  %v2612_v26 = vcombine.low %v5524_v19, %v5523_v17  ;;  %v5555_v17 = vld [vmem:[#allocation171_spill] sm:$0xff] }
 0x3aa   : > { %2790 = vmatprep.subr.bf16.mxu1 %v3769_v31 }
 0x3ad   : > { %2791 = vmatpush3.bf16.msra.mxu1 %v2606_v30  ;;  %v5527_v30 = vld [vmem:[#allocation128_spill] sm:$0xff] }
 0x3ae   : > { %2816 = vmatprep.subr.bf16.mxu1 %v3769_v31  ;;  %v2614_v34 = vcombine.low %v5528_v32, %v5527_v30  ;;  %v5559_v30 = vld [vmem:[#allocation175_spill] sm:$0xff] }
 0x3b0   : > { %2793 = vmatmul.mubr.bf16.vlgmr.msra.gmra.mrb[8].mxu1 %v1682_v35  ;;  %v5530_v35 = vld [vmem:[#allocation129_spill] sm:$0xff] }
 0x3b1   : > { %2817 = vmatpush3.bf16.msra.mxu1 %v2617_v27  ;;  %2832 = vmatprep.mubr.msk.bf16.mxu1 %vm3770_vm0, %v3769_v31  ;;  %v5529_v27 = vld [vmem:[#allocation130_spill] sm:$0xff] }
 0x3b2   : > { %2818 = vmatprep.subr.bf16.mxu1 %v3769_v31  ;;  %v2615_v37 = vcombine.low %v5530_v35, %v5529_v27 }
 0x3b5   : > { %2819 = vmatpush3.bf16.msra.mxu1 %v2618_v41 }
 0x3b6   : > { %2820 = vmatprep.subr.bf16.mxu1 %v3769_v31 }
 0x3b9   : > { %2821 = vmatpush3.bf16.msra.mxu1 %v2619_v43 }
 0x3ba   : > { %2822 = vmatprep.subr.bf16.mxu1 %v3769_v31 }
 0x3bd   : > { %2823 = vmatpush3.bf16.msra.mxu1 %v2620_v46  ;;  %v5533_v46 = vld [vmem:[#allocation149_spill] sm:$0xff] }
 0x3be   : > { %2824 = vmatprep.subr.bf16.mxu1 %v3769_v31  ;;  %v2626_v42 = vcombine.low %v5533_v46, %v5532_v45 }
 0x3c1   : > { %2825 = vmatpush3.bf16.msra.mxu1 %v2621_v48  ;;  %v5534_v48 = vld [vmem:[#allocation152_spill] sm:$0xff] }
 0x3c2   : > { %2826 = vmatprep.subr.bf16.mxu1 %v3769_v31  ;;  %v2627_v51 = vcombine.low %v5535_v49, %v5534_v48 }
 0x3c5   : > { %2827 = vmatpush3.bf16.msra.mxu1 %v2622_v52  ;;  %v5536_v52 = vld [vmem:[#allocation154_spill] sm:$0xff] }
 0x3c6   : > { %2828 = vmatprep.subr.bf16.mxu1 %v3769_v31  ;;  %v2628_v55 = vcombine.low %v5537_v53, %v5536_v52 }
 0x3c9   : > { %2829 = vmatpush3.bf16.msra.mxu1 %v2623_v59  ;;  %v2629_v59 = vcombine.low %v4690_v50, %v4692_v58  ;;  %v5543_v58 = vld [vmem:[#allocation161_spill] sm:$0xff] }
 0x3ca   : > { %2830 = vmatprep.subr.bf16.mxu1 %v3769_v31 }
 0x3cd   : > { %2831 = vmatpush3.bf16.msra.mxu1 %v2624_v44  ;;  %v5540_v44 = vld [vmem:[#allocation156_spill] sm:$0xff] }
 0x3ce   : > { %2856 = vmatprep.subr.bf16.mxu1 %v3769_v31 }
 0x3d0   : > { %2833 = vmatmul.mubr.bf16.vlgmr.msra.gmra.mrb[12].mxu1 %v1874_v54  ;;  %v2631_v54 = vcombine.low %v5540_v44, %v5539_v63  ;;  %v5565_v63 = vld [vmem:[#allocation162_spill] sm:$0xff] }
 0x3d1   : > { %2872 = vmatprep.mubr.msk.bf16.mxu1 %vm3770_vm0, %v3769_v31 }
 0x41a   : > { %v2176_v53 = vpop.xlane.xlu0 %2175 }
 0x463   : > { %v1574_v6 = vpop.f32.mrb[4].mxu1 }
 0x464   : > { %v1575_v10 = vadd.f32 %v5514_v8, %v1574_v6  ;;  %v2754_v33 = vpop.f32.mrb[5].mxu1  ;;  %v2633_v6 = vcombine.low %v5544_v4, %v5543_v58 }
 0x465   : > { %v1577_v1 = vpop.f32.mrb[6].mxu1 }
 0x466   : > { %v1580_v3 = vmax.f32 %v1575_v10, 0.0  ;;  %v2755_v12 = vpop.f32.mrb[7].mxu1 }
 0x468   : > { %v1581_v16 = vpack.c.bf16 %v1580_v3, %v1580_v3 }
 0x46a   : > { %2773 = vmatmul.mubr.bf16.vlgmr.msra.gmra.mrb[4].mxu0 %v1581_v16  ;;  %v5548_v16 = vld [vmem:[#allocation166_spill] sm:$0xff] }
 0x46b   : > { %2797 = vmatpush3.bf16.msra.mxu0 %v2608_v14  ;;  %2812 = vmatprep.mubr.msk.bf16.mxu0 %vm3770_vm0, %v3769_v31  ;;  %v2635_v14 = vcombine.low %v5547_v7, %v5546_v5  ;;  %v2636_v11 = vcombine.low %v5549_v9, %v5548_v16 }
 0x46c   : > { %2798 = vmatprep.subr.bf16.mxu0 %v3769_v31 }
 0x46d   : > { %2857 = vmatpush3.bf16.msra.mxu1 %v2635_v14 }
 0x46e   : > { %2858 = vmatprep.subr.bf16.mxu1 %v3769_v31 }
 0x46f   : > { %2799 = vmatpush3.bf16.msra.mxu0 %v2609_v18  ;;  %v5550_v18 = vld [vmem:[#allocation168_spill] sm:$0xff] }
 0x470   : > { %2800 = vmatprep.subr.bf16.mxu0 %v3769_v31  ;;  %v2637_v20 = vcombine.low %v5551_v56, %v5550_v18 }
 0x471   : > { %2859 = vmatpush3.bf16.msra.mxu1 %v2636_v11 }
 0x472   : > { %2860 = vmatprep.subr.bf16.mxu1 %v3769_v31 }
 0x473   : > { %2801 = vmatpush3.bf16.msra.mxu0 %v2610_v13  ;;  %v5552_v13 = vld [vmem:[#allocation170_spill] sm:$0xff] }
 0x474   : > { %2802 = vmatprep.subr.bf16.mxu0 %v3769_v31  ;;  %v2638_v22 = vcombine.low %v5553_v15, %v5552_v13 }
 0x475   : > { %2861 = vmatpush3.bf16.msra.mxu1 %v2637_v20 }
 0x476   : > { %2862 = vmatprep.subr.bf16.mxu1 %v3769_v31 }
 0x477   : > { %2803 = vmatpush3.bf16.msra.mxu0 %v2611_v24  ;;  %v5554_v24 = vld [vmem:[#allocation172_spill] sm:$0xff] }
 0x478   : > { %2804 = vmatprep.subr.bf16.mxu0 %v3769_v31  ;;  %v2639_v19 = vcombine.low %v5555_v17, %v5554_v24 }
 0x479   : > { %2863 = vmatpush3.bf16.msra.mxu1 %v2638_v22 }
 0x47a   : > { %2864 = vmatprep.subr.bf16.mxu1 %v3769_v31 }
 0x47b   : > { %2805 = vmatpush3.bf16.msra.mxu0 %v2612_v26  ;;  %v5556_v26 = vld [vmem:[#allocation174_spill] sm:$0xff] }
 0x47c   : > { %2806 = vmatprep.subr.bf16.mxu0 %v3769_v31  ;;  %v2640_v21 = vcombine.low %v5557_v28, %v5556_v26 }
 0x47d   : > { %2865 = vmatpush3.bf16.msra.mxu1 %v2639_v19 }
 0x47e   : > { %2866 = vmatprep.subr.bf16.mxu1 %v3769_v31 }
 0x47f   : > { %2807 = vmatpush3.bf16.msra.mxu0 %v2613_v23  ;;  %v5558_v23 = vld [vmem:[#allocation176_spill] sm:$0xff] }
 0x480   : > { %2808 = vmatprep.subr.bf16.mxu0 %v3769_v31  ;;  %v2641_v32 = vcombine.low %v5559_v30, %v5558_v23 }
 0x481   : > { %2867 = vmatpush3.bf16.msra.mxu1 %v2640_v21 }
 0x482   : > { %2868 = vmatprep.subr.bf16.mxu1 %v3769_v31 }
 0x483   : > { %v1771_v25 = vpop.f32.mrb[8].mxu1  ;;  %2809 = vmatpush3.bf16.msra.mxu0 %v2614_v34  ;;  %v5560_v34 = vld [vmem:[#allocation178_spill] sm:$0xff] }
 0x484   : > { %v1772_v41 = vadd.f32 %v5531_v39, %v1771_v25  ;;  %v2794_v36 = vpop.f32.mrb[9].mxu1  ;;  %2810 = vmatprep.subr.bf16.mxu0 %v3769_v31  ;;  %v5561_v25 = vld [vmem:[#allocation177_spill] sm:$0xff] }
 0x485   : > { %v1774_v38 = vpop.f32.mrb[10].mxu1  ;;  %2869 = vmatpush3.bf16.msra.mxu1 %v2641_v32  ;;  %v2642_v27 = vcombine.low %v5561_v25, %v5560_v34  ;;  %v5562_v36 = vld [vmem:[#allocation97_spill] sm:$0xff] }
 0x486   : > { %v1777_v43 = vmax.f32 %v1772_v41, 0.0  ;;  %v2795_v29 = vpop.f32.mrb[11].mxu1  ;;  %2870 = vmatprep.subr.bf16.mxu1 %v3769_v31 }
 0x487   : > { %2811 = vmatpush3.bf16.msra.mxu0 %v2615_v37 }
 0x488   : > { %v1778_v47 = vpack.c.bf16 %v1777_v43, %v1777_v43  ;;  %2836 = vmatprep.subr.bf16.mxu0 %v3769_v31 }
 0x489   : > { %2871 = vmatpush3.bf16.msra.mxu1 %v2642_v27 }
 0x48a   : > { %2813 = vmatmul.mubr.bf16.vlgmr.msra.gmra.mrb[8].mxu0 %v1778_v47 }
 0x48b   : > { %2837 = vmatpush3.bf16.msra.mxu0 %v2626_v42  ;;  %2852 = vmatprep.mubr.msk.bf16.mxu0 %vm3770_vm0, %v3769_v31  ;;  %v5563_v42 = vld [vmem:[#allocation131_spill] sm:$0xff] }
 0x48c   : > { %2838 = vmatprep.subr.bf16.mxu0 %v3769_v31 }
 0x48f   : > { %2839 = vmatpush3.bf16.msra.mxu0 %v2627_v51 }
 0x490   : > { %2840 = vmatprep.subr.bf16.mxu0 %v3769_v31 }
 0x493   : > { %2841 = vmatpush3.bf16.msra.mxu0 %v2628_v55 }
 0x494   : > { %2842 = vmatprep.subr.bf16.mxu0 %v3769_v31 }
 0x497   : > { %2843 = vmatpush3.bf16.msra.mxu0 %v2629_v59 }
 0x498   : > { %2844 = vmatprep.subr.bf16.mxu0 %v3769_v31 }
 0x49b   : > { %2845 = vmatpush3.bf16.msra.mxu0 %v2630_v62 }
 0x49c   : > { %2846 = vmatprep.subr.bf16.mxu0 %v3769_v31 }
 0x49f   : > { %2847 = vmatpush3.bf16.msra.mxu0 %v2631_v54 }
 0x4a0   : > { %2848 = vmatprep.subr.bf16.mxu0 %v3769_v31 }
 0x4a3   : > { %v1963_v50 = vpop.f32.mrb[12].mxu1  ;;  %2849 = vmatpush3.bf16.msra.mxu0 %v2632_v40 }
 0x4a4   : > { %v1964_v8 = vadd.f32 %v5545_v60, %v1963_v50  ;;  %v2834_v10 = vpop.f32.mrb[13].mxu1  ;;  %2850 = vmatprep.subr.bf16.mxu0 %v3769_v31 }
 0x4a5   : > { %v1966_v33 = vpop.f32.mrb[14].mxu1 }
 0x4a6   : > { %v1969_v1 = vmax.f32 %v1964_v8, 0.0  ;;  %v2835_v3 = vpop.f32.mrb[15].mxu1 }
 0x4a7   : > { %2851 = vmatpush3.bf16.msra.mxu0 %v2633_v6 }
 0x4a8   : > { %v1970_v12 = vpack.c.bf16 %v1969_v1, %v1969_v1 }
 0x4aa   : > { %2853 = vmatmul.mubr.bf16.vlgmr.msra.gmra.mrb[12].mxu0 %v1970_v12 }
 0x53d   : > { %v1670_v35 = vpop.f32.mrb[4].mxu0 }
 0x53e   : > { %v2774_v37 = vpop.f32.mrb[5].mxu0  ;;  %v1671_v38 = vadd.f32 %v5562_v36, %v1670_v35 }
 0x53f   : > { %v1673_v39 = vpop.f32.mrb[6].mxu0 }
 0x540   : > { %v2775_v41 = vpop.f32.mrb[7].mxu0  ;;  %v2597_v43 = vmul.f32 -1.442695, %v1671_v38 }
 0x542   : > { %3110 = vpow2.f32 %v2597_v43 }
 0x54c   : > { %v3111_v29 = vpop.eup %3110 }
 0x54d   : > { %v1679_v45 = vadd.f32 1.0, %v3111_v29 }
 0x54f   : > { %3112 = vrcp.f32 %v1679_v45 }
 0x559   : > { %v3113_v51 = vpop.eup %3112 }
 0x55d   : > { %v1867_v46 = vpop.f32.mrb[8].mxu0 }
 0x55e   : > { %v1868_v47 = vadd.f32 %v5563_v42, %v1867_v46  ;;  %v2814_v48 = vpop.f32.mrb[9].mxu0 }
 0x55f   : > { %v1870_v31 = vpop.f32.mrb[10].mxu0 }
 0x560   : > { %3114 = vtanh.f32 %v1868_v47  ;;  %v2815_v49 = vpop.f32.mrb[11].mxu0 }
 0x56a   : > { %v3115_v52 = vpop.eup %3114 }
 0x56b   : > { %v2167_v55 = vmul.f32 %v3115_v52, %v3113_v51 }
 0x56d   : > { %v2177_v59 = vmul.f32 %v2176_v53, %v2167_v55 }
 0x56f   : > { %v2178_v61 = vadd.f32 %v2177_v59, %v5017_v57 }
 0x571   : > { %2184 = vst [vmem:[#allocation3] sm:$0xff] %v2178_v61  ;;  %2182 = vst [vmem:[%s929_s9] sm:$0xff] %v2178_v61 }
 0x57d   : > { %v2059_v62 = vpop.f32.mrb[12].mxu0 }
 0x57e   : > { %v2060_v44 = vadd.f32 %v5565_v63, %v2059_v62  ;;  %v2854_v54 = vpop.f32.mrb[13].mxu0 }
 0x57f   : > { %v2062_v0 = vpop.f32.mrb[14].mxu0 }
 0x580   : > { %v2065_v2 = vmax.f32 %v2060_v44, 0.0  ;;  %v2855_v40 = vpop.f32.mrb[15].mxu0 }
 0x582   : > { %v2066_v50 = vpack.c.bf16 %v2065_v2, %v2065_v2 }
 0x584   : > { %2873 = vmatmul.mubr.bf16.vlgmr.msra.gmra.mrb[16].mxu1 %v2066_v50 }
 0x585   : > { %3613 = shalt.err (!%p3610_p8)
}
 0x586   : > { %s3614_s9 = scalar_lea.hbm %s5110_s29, 128  ;;  %s3618_s8 = scalar_lea.hbm %s5566_s22, 1024 }
 0x587   : > { %p3615_p9 = scmp.ne.s32.totalorder %s5110_s29, %s3614_s9  ;;  %p3619_p1 = scmp.lt.u32.totalorder %s5110_s29, %s5566_s22 }
 0x588   : > { %p3620_p12 = scmp.lt.u32.totalorder %s3618_s8, %s3614_s9  ;;  %p3622_p0 = scmp.lt.u32.totalorder %s3614_s9, %s5110_s29 }
 0x589   : > { %p3616_p5 = pnand %p3615_p9, %p5567_p4 }
 0x58a   : > { %p3621_p11 = por %p3620_p12, %p3619_p1 }
 0x58b   : > { %p3617_p3 = pneg %p3616_p5 }
 0x58c   : > { %p3623_p6 = por %p3622_p0, %p3621_p11 }
 0x58e   : > { %p3624_p10 = pnand %p3623_p6, %p3617_p3 }
 0x590   : > { %3627 = shalt.err (!%p3624_p10)
}
 0x591   : > { %2943 = dma.vmem_to_hbm [thread:$0]  (%p5567_p4), %s2220_s4, 128, %s5110_s29, %s2191_s3   ;;  %v5568_v58 = vld [vmem:[#allocation179_spill] sm:$0xff] }
 0x592   : > { %s5569_s1 = scalar_lea.vmem [#allocation31], %s4338_s0  ;;  %s5570_s29 = sshll.u32 %s5564_s7, 7 }
 0x593   : > { %s2205_s26 = sshll.u32 %s5569_s1, 4  ;;  %s5571_s24 = sld [smem:[#allocation193_spill]]  ;;  %s5142_s26 = int_to_ptr.vmem [resolvable:$true] %s2205_s26 }
 0x594   : > { %s5572_s27 = smov %s5569_s1  ;;  %s2186_s17 = scalar_lea.sflag [#allocation6], %s4335_s2 }
 0x595   : > { %s3628_s8 = scalar_lea.vmem %s5142_s26, 128  ;;  %s3772_s7 = smov [#allocation31]  }
 0x596   : > { %p3629_p13 = scmp.ne.s32.totalorder %s5142_s26, %s3628_s8  ;;  %s3632_s6 = sshll.u32 %s3772_s7, 4  ;;  %s3633_s6 = int_to_ptr.vmem [resolvable:$false] %s3632_s6 }
 0x597   : > { %s3634_s1 = scalar_lea.vmem %s3633_s6, 256  ;;  %p3635_p8 = scmp.lt.s32.totalorder %s5142_s26, %s3633_s6 }
 0x598   : > { %p3630_p2 = pnand %p3629_p13, %p5567_p4  ;;  %p3636_p9 = scmp.lt.s32.totalorder %s3634_s1, %s3628_s8 }
 0x599   : > { %s5140_s9 = scalar_lea.hbm %s5571_s24, %s5570_s29 }
 0x59a   : > { %p3631_p7 = pneg %p3630_p2  ;;  %p3637_p5 = por %p3636_p9, %p3635_p8 }
 0x59c   : > { %p3638_p3 = pnand %p3637_p5, %p3631_p7 }
 0x657   : > { %v2155_v57 = vpop.f32.mrb[16].mxu1 }
 0x658   : > { %v2156_v4 = vadd.f32 %v5568_v58, %v2155_v57  ;;  %v2874_v6 = vpop.f32.mrb[17].mxu1 }
 0x659   : > { %v2158_v60 = vpop.f32.mrb[18].mxu1 }
 0x65a   : > { %v2643_v8 = vmul.f32 -1.442695, %v2156_v4  ;;  %v2875_v10 = vpop.f32.mrb[19].mxu1 }
 0x65c   : > { %3116 = vpow2.f32 %v2643_v8 }
 0x65d   : > { %3118 = vtanh.f32 %v2178_v61 }
 0x666   : > { %v3117_v33 = vpop.eup %3116 }
 0x667   : > { %v2164_v1 = vadd.f32 1.0, %v3117_v33  ;;  %v3119_v3 = vpop.eup %3118 }
 0x669   : > { %3120 = vrcp.f32 %v2164_v1 }
 0x673   : > { %v3121_v12 = vpop.eup %3120 }
 0x674   : > { %v2180_v5 = vmul.f32 %v3121_v12, %v3119_v3 }
 0x676   : > { %2181 = vst [vmem:[%s5572_s27] sm:$0xff] %v2180_v5  ;;  %2183 = vst [vmem:[#allocation2] sm:$0xff] %v2180_v5 }
 0x677   : > { %3641 = shalt.err (!%p3638_p3)
}
 0x678   : > { %s3642_s2 = scalar_lea.hbm %s5140_s9, 128  ;;  %s3646_s4 = scalar_lea.hbm %s5571_s24, 1024 }
 0x679   : > { %p3643_p1 = scmp.ne.s32.totalorder %s5140_s9, %s3642_s2  ;;  %p3647_p0 = scmp.lt.u32.totalorder %s5140_s9, %s5571_s24 }
 0x67a   : > { %p3648_p6 = scmp.lt.u32.totalorder %s3646_s4, %s3642_s2  ;;  %p3650_p13 = scmp.lt.u32.totalorder %s3642_s2, %s5140_s9 }
 0x67b   : > { %p3644_p12 = pnand %p3643_p1, %p5567_p4 }
 0x67c   : > { %p3649_p10 = por %p3648_p6, %p3647_p0 }
 0x67d   : > { %p3645_p11 = pneg %p3644_p12 }
 0x67e   : > { %p3651_p2 = por %p3650_p13, %p3649_p10 }
 0x680   : > { %p3652_p7 = pnand %p3651_p2, %p3645_p11 }
 0x682   : > { %3655 = shalt.err (!%p3652_p7)
}
 0x683   : > { %2942 = dma.vmem_to_hbm [thread:$0]  (%p5567_p4), %s5142_s26, 128, %s5140_s9, %s2186_s17  }
 0x684 PF: > { %s5573_s8 = sld [smem:[#allocation45_spill]]  ;;  %p3039_p8 = scmp.ge.s32.totalorder %s3746_s28, 2 }
 0x685   : > { %p5574_p9 = scmp.ne.s32.totalorder %s5297_s18, 0 }
 0x687   : > { %p3000_p5 = pnand %p3039_p8, %p5574_p9 }
 0x68a   : > { %s2231_s7 = sand.u32 1, %s5573_s8  }
 0x68b   : > { %s2232_s6 = scalar_lea.sflag [#allocation6], %s2231_s7 }
 0x68c   : > { %3717 = dma.done.wait (!%p3000_p5), %s2232_s6, 128  }
 0x68d   : > { %3719 = vsyncadd (!%p3000_p5), %s2232_s6, 4294967168  ;;  %s2241_s1 = scalar_lea.sflag [#allocation33], %s2231_s7 }
 0x68e   : > { %3721 = dma.done.wait (!%p3000_p5), %s2241_s1, 128  }
 0x68f   : > { %3723 = vsyncadd (!%p3000_p5), %s2241_s1, 4294967168  ;;  %s49_s28 = sadd.s32 1, %s3746_s28   ;;  %s5575_s2 = sld [smem:[#allocation46_spill]] }
 0x690   : > { %p46_p3 = scmp.ge.s32.totalorder %s49_s28, 10   ;;  %s5576_s25 = sld [smem:[#allocation47_spill]] }
 0x691   : > { %s5577_s27 = sld [smem:[#allocation49_spill]]  ;;  %s5578_s26 = smov %s4285_s5 }
 0x692   : > { %s5579_s3 = smov %s5581_s20  ;;  %48 = sbr.rel (!%p46_p3) target bundleno = 32 (0x20), region = 232 }
 0x699   :  { %2246 = vsyncpa [#allocation5], 1 }
 0x69a   :  { %2248 = vsyncpa [#allocation5 + $0x1], 1 }
 0x69b   :  { %2249 = vsyncpa [#allocation8], 1 }
 0x69c   :  { %2250 = vsyncpa [#allocation11], 1 }
 0x69d   :  { %2251 = vsyncpa [#allocation14], 1 }
 0x69e   :  { %2252 = vsyncpa [#allocation17], 1 }
 0x69f   :  { %2253 = vsyncpa [#allocation20], 1 }
 0x6a0   :  { %2254 = vsyncpa [#allocation23], 1 }
 0x6a1   :  { %2255 = vsyncpa [#allocation26], 1 }
 0x6a2   :  { %2256 = vsyncpa [#allocation29], 1 }
 0x6a3   :  { %2257 = vsyncpa [#allocation6], 1 }
 0x6a4   :  { %2259 = vsyncpa [#allocation6 + $0x1], 1 }
 0x6a5   :  { %2260 = vsyncpa [#allocation33], 1 }
 0x6a6   :  { %2262 = vsyncpa [#allocation33 + $0x1], 1 }

</bundles_post_ra>
